<compile_context>
chip_gen: v7x
topology: tpu7x:2x2x1
jax: 0.10.0
libtpu: 0.0.40
codegen_flags: <defaults>
</compile_context>

<pallas_src>
import jax
import jax.numpy as jnp
from jax.experimental import pallas as pl
from jax.experimental.pallas import tpu as pltpu


# ----------------------------- fused Pallas kernel -------------------------

def _make_disc_kernel(n, oh1, ow1, oh2, ow2, oh3, ow3, c1p, c2, k=4):
    """Build the fused discriminator kernel for static shape parameters.

    In-kernel activations use (H, W, N, C) layout: H and W are leading
    (non-layout) dims, so every im2col patch extraction is a static
    unit-stride slice; C stays lane-dense (128).  Each conv is a single
    long-K GEMM.
    """
    assert (oh1 + 2) % 2 == 0 and (ow1 + 2) % 2 == 0

    def _pad_hw(a, c):
        # Zero-pad spatial dims 0 (H) and 1 (W) by 1 via concatenation along
        # leading dims (no lane/sublane shuffles; jnp.pad avoided in-kernel).
        h, w = a.shape[0], a.shape[1]
        zc = jnp.zeros((h, 1, n, c), jnp.bfloat16)
        a = jnp.concatenate([zc, a, zc], axis=1)
        zr = jnp.zeros((1, w + 2, n, c), jnp.bfloat16)
        return jnp.concatenate([zr, a, zr], axis=0)

    def kernel(cols1_ref, w1_ref, b1_ref, w2_ref, b2_ref, gamma_ref, beta_ref,
               w3_ref, b3_ref, o_ref):
        # ---- Layer 1: conv1 (pre-im2col'd input) + LeakyReLU(0.2) ----
        acc1 = jnp.dot(cols1_ref[...], w1_ref[...],
                       preferred_element_type=jnp.float32)
        acc1 = acc1 + b1_ref[...]
        # LeakyReLU as a single vmax; immediate bf16 cast so the f32
        # accumulator's live range ends here (keeps vreg pressure low).
        h1 = jnp.maximum(acc1, 0.2 * acc1).astype(jnp.bfloat16)
        h1 = h1.reshape(oh1, ow1, n, c1p)                  # (H, W, N, C)

        # ---- Layer 2: conv2 (k=4, stride 2, pad 1) + BatchNorm + LeakyReLU ----
        h1p = _pad_hw(h1, c1p)                             # (H+2, W+2, N, C)
        # Split padded rows/cols into (pair, parity): padded index 2*q + r.
        # Patch offset i = 2*ic + ir then reads pair rows [ic : ic+OH2] at
        # parity ir -> every slice below is static and unit-stride.
        hp2, wp2 = (oh1 + 2) // 2, (ow1 + 2) // 2
        par = {}
        rsplit = h1p.reshape(hp2, 2, ow1 + 2, n, c1p)
        for ir in range(2):
            rows = rsplit[:, ir]                           # (hp2, W+2, N, C)
            csplit = rows.reshape(hp2, wp2, 2, n, c1p)
            for jr in range(2):
                par[(ir, jr)] = csplit[:, :, jr]           # (hp2, wp2, N, C)
        slabs = []
        for i in range(k):
            ic, ir = divmod(i, 2)
            for j in range(k):
                jc, jr = divmod(j, 2)
                slabs.append(par[(ir, jr)][ic:ic + oh2, jc:jc + ow2])
        cols2 = jnp.concatenate(slabs, axis=-1)            # (OH2, OW2, N, 16*C)
        cols2 = cols2.reshape(oh2 * ow2 * n, k * k * c1p)  # (32, 2048)

        acc2 = jnp.dot(cols2, w2_ref[...], preferred_element_type=jnp.float32)
        acc2 = acc2 + b2_ref[...]
        # TODO(synk): BatchNorm2d running-stat (eval-mode) bookkeeping is not
        # modeled; forward uses training-mode batch statistics (PyTorch default).
        mean = jnp.mean(acc2, axis=0, keepdims=True)       # one-pass stats
        meansq = jnp.mean(acc2 * acc2, axis=0, keepdims=True)
        var = jnp.maximum(meansq - mean * mean, 0.0)       # biased variance
        h2 = (acc2 - mean) * jax.lax.rsqrt(var + 1e-5)
        h2 = h2 * gamma_ref[...] + beta_ref[...]
        h2 = jnp.maximum(h2, 0.2 * h2).astype(jnp.bfloat16)
        h2 = h2.reshape(oh2, ow2, n, c2)                   # (H, W, N, C)

        # ---- Layer 3: conv3 (k=4, stride 1, pad 1) + Sigmoid ----
        h2p = _pad_hw(h2, c2)                              # (OH2+2, OW2+2, N, C)
        slabs = []
        for i in range(k):
            for j in range(k):
                slabs.append(h2p[i:i + oh3, j:j + ow3])    # (OH3, OW3, N, C)
        cols3 = jnp.concatenate(slabs, axis=-1)
        cols3 = cols3.reshape(oh3 * ow3 * n, k * k * c2)   # (18, 2048)

        acc3 = jnp.dot(cols3, w3_ref[...], preferred_element_type=jnp.float32)
        acc3 = acc3 + b3_ref[...]
        o_ref[...] = jax.nn.sigmoid(acc3)                  # lane-dense (M3, 128)

    return kernel


def _run_fused(cols1, w1, b1, w2, b2, gamma, beta, w3, b3, dims):
    n, oh1, ow1, oh2, ow2, oh3, ow3 = dims
    c1p = w1.shape[1]          # padded layer-1 Cout (128)
    c2 = w2.shape[1]           # layer-2 Cout (128) == layer-3 Cin
    c3p = w3.shape[1]          # padded layer-3 Cout (128)
    m2 = oh2 * ow2 * n
    m3 = oh3 * ow3 * n

    kernel = _make_disc_kernel(n, oh1, ow1, oh2, ow2, oh3, ow3, c1p, c2)
    args = (cols1, w1, b1, w2, b2, gamma, beta, w3, b3)

    flops = 2 * (cols1.shape[0] * cols1.shape[1] * c1p
                 + m2 * w2.shape[0] * c2
                 + m3 * w3.shape[0] * c3p)
    bytes_accessed = sum(int(a.size) * a.dtype.itemsize for a in args) + m3 * c3p * 4

    vmem_spec = pl.BlockSpec(memory_space=pltpu.MemorySpace.VMEM)
    # NOTE: at batch=2 there is nothing worth splitting; for larger batches,
    # add a grid over batch with dimension_semantics=("parallel",) so v7x's
    # two TensorCores are both used and VMEM stays bounded per step.
    return pl.pallas_call(
        kernel,
        out_shape=jax.ShapeDtypeStruct((m3, c3p), jnp.float32),
        in_specs=[vmem_spec for _ in args],
        out_specs=vmem_spec,
        compiler_params=pltpu.CompilerParams(vmem_limit_bytes=32 * 1024 * 1024),
        cost_estimate=pl.CostEstimate(flops=int(flops),
                                      transcendentals=int(m3 * c3p + c2),
                                      bytes_accessed=int(bytes_accessed)),
    )(*args)


# ------------------------------- JAX glue ----------------------------------

def _im2col_hwnc(x_hwnc, k, stride, pad):
    """Extract kxk patches from an (H, W, N, C) tensor.

    Rows ordered (y, x, b); columns ordered (kh, kw, c).  Returns
    ([OH*OW*N, k*k*C], (OH, OW)).
    """
    x = jnp.pad(x_hwnc, ((pad, pad), (pad, pad), (0, 0), (0, 0)))
    hp, wp, n, c = x.shape
    oh = (hp - k) // stride + 1
    ow = (wp - k) // stride + 1
    patches = []
    for i in range(k):
        for j in range(k):
            patches.append(x[i:i + stride * oh:stride, j:j + stride * ow:stride])
    cols = jnp.concatenate(patches, axis=-1)
    return cols.reshape(oh * ow * n, k * k * c), (oh, ow)


def init_params(key):
    """PyTorch-layout parameters ([Cout, Cin, kH, kW] conv weights, 1-D biases)."""
    ks = jax.random.split(key, 6)

    def conv_w(k, cout, cin, ksz, scale=0.05):
        return jax.random.normal(k, (cout, cin, ksz, ksz), jnp.float32) * scale

    return {
        "w1": conv_w(ks[0], 64, 4, 4),
        "b1": jax.random.normal(ks[1], (64,), jnp.float32) * 0.01,
        "w2": conv_w(ks[2], 128, 64, 4),
        "b2": jax.random.normal(ks[3], (128,), jnp.float32) * 0.01,
        "gamma": jnp.ones((128,), jnp.float32),     # BatchNorm2d weight init
        "beta": jnp.zeros((128,), jnp.float32),     # BatchNorm2d bias init
        "w3": conv_w(ks[4], 1, 128, 4),
        "b3": jax.random.normal(ks[5], (1,), jnp.float32) * 0.01,
    }


def prepare_kernel_params(p):
    """Convert PyTorch-layout params to the fused-kernel layouts (done once)."""
    def flat_w(w):     # [Cout,Cin,kh,kw] -> [kh*kw*Cin, Cout], (kh,kw,c) rows
        co, ci, kh, kw = w.shape
        return jnp.transpose(w, (2, 3, 1, 0)).reshape(kh * kw * ci, co)

    def stack_w(w):    # [Cout,Cin,kh,kw] -> [kh*kw, Cin, Cout]
        co, ci, kh, kw = w.shape
        return jnp.transpose(w, (2, 3, 1, 0)).reshape(kh * kw, ci, co)

    # Layer 1: pad contraction dim 64 -> 128 and Cout 64 -> 128 (zeros).  The
    # padded output channels stay exactly 0 through LeakyReLU and hit zero
    # rows of w2, so padding never leaks into the result.
    w1 = flat_w(p["w1"])
    w1 = jnp.pad(w1, ((0, 128 - w1.shape[0]), (0, 128 - w1.shape[1])))
    b1 = jnp.pad(p["b1"], (0, 128 - p["b1"].shape[0]))[None, :]

    # Layer 2: pad Cin 64 -> 128 (matches layer-1 Cout padding) and flatten to
    # [kh*kw*Cin_pad, Cout] = (2048, 128) for a single long-K GEMM.
    w2 = stack_w(p["w2"])                                   # (16, 64, 128)
    w2 = jnp.pad(w2, ((0, 0), (0, 128 - w2.shape[1]), (0, 0)))
    w2 = w2.reshape(-1, w2.shape[2])                        # (2048, 128)
    b2 = p["b2"][None, :]
    gamma = p["gamma"][None, :]
    beta = p["beta"][None, :]

    # Layer 3: pad Cout 1 -> 128 (lane-dense store) and flatten to (2048, 128).
    w3 = stack_w(p["w3"])                                   # (16, 128, 1)
    w3 = jnp.pad(w3, ((0, 0), (0, 0), (0, 128 - w3.shape[2])))
    w3 = w3.reshape(-1, w3.shape[2])                        # (2048, 128)
    b3 = jnp.pad(p["b3"], (0, 128 - p["b3"].shape[0]))[None, :]

    return {
        "w1": w1.astype(jnp.bfloat16), "b1": b1,
        "w2": w2.astype(jnp.bfloat16), "b2": b2,
        "gamma": gamma, "beta": beta,
        "w3": w3.astype(jnp.bfloat16), "b3": b3,
    }


@jax.jit
def discriminator_forward(kparams, x, y):
    """x, y: NCHW f32 with 2 channels each.  Returns NCHW [N, 1, OH, OW]."""
    inp = jnp.concatenate([x, y], axis=1)                   # (N, 4, H, W)
    n = inp.shape[0]
    h = jnp.transpose(inp, (2, 3, 0, 1))                    # (H, W, N, C)

    # Layer-1 im2col stays in the wrapper: it reads the raw HBM input exactly
    # once and its (128, 128) bf16 result is the only activation DMA'd into
    # the fused kernel (K padded 64 -> 128 for a lane-dense load).
    cols1, (oh1, ow1) = _im2col_hwnc(h, 4, 2, 1)
    k1 = kparams["w1"].shape[0]
    cols1 = jnp.pad(cols1, ((0, 0), (0, k1 - cols1.shape[1]))).astype(jnp.bfloat16)

    oh2, ow2 = (oh1 + 2 - 4) // 2 + 1, (ow1 + 2 - 4) // 2 + 1
    oh3, ow3 = (oh2 + 2 - 4) // 1 + 1, (ow2 + 2 - 4) // 1 + 1

    out = _run_fused(cols1, kparams["w1"], kparams["b1"],
                     kparams["w2"], kparams["b2"],
                     kparams["gamma"], kparams["beta"],
                     kparams["w3"], kparams["b3"],
                     (n, oh1, ow1, oh2, ow2, oh3, ow3))

    # Column 0 of the lane-dense (M3, 128) output is the real conv3 channel;
    # kernel rows are ordered (y, x, b).
    out = out[:, 0].reshape(oh3, ow3, n)
    return jnp.transpose(out, (2, 0, 1))[:, None, :, :]     # NCHW (N, 1, OH, OW)


# -------------------- pure-JAX f32 reference (for checking) ----------------

def _im2col_nhwc(x_nhwc, k, stride, pad):
    x = jnp.pad(x_nhwc, ((0, 0), (pad, pad), (pad, pad), (0, 0)))
    nb, hp, wp, c = x.shape
    oh = (hp - k) // stride + 1
    ow = (wp - k) // stride + 1
    patches = []
    for i in range(k):
        for j in range(k):
            patches.append(x[:, i:i + stride * oh:stride,
                             j:j + stride * ow:stride, :])
    cols = jnp.concatenate(patches, axis=-1)
    return cols.reshape(nb * oh * ow, k * k * c), (nb, oh, ow)


def _reference_forward(p, x, y):
    inp = jnp.concatenate([x, y], axis=1)
    h = jnp.transpose(inp, (0, 2, 3, 1))

    def flat_w(w):
        co, ci, kh, kw = w.shape
        return jnp.transpose(w, (2, 3, 1, 0)).reshape(kh * kw * ci, co)

    cols, (n, oh, ow) = _im2col_nhwc(h, 4, 2, 1)
    a = cols @ flat_w(p["w1"]) + p["b1"][None, :]
    h = jnp.where(a > 0, a, 0.2 * a).reshape(n, oh, ow, 64)

    cols, (n, oh, ow) = _im2col_nhwc(h, 4, 2, 1)
    a = cols @ flat_w(p["w2"]) + p["b2"][None, :]
    mean = jnp.mean(a, axis=0, keepdims=True)
    var = jnp.mean((a - mean) ** 2, axis=0, keepdims=True)
    a = (a - mean) * jax.lax.rsqrt(var + 1e-5) * p["gamma"][None, :] + p["beta"][None, :]
    h = jnp.where(a > 0, a, 0.2 * a).reshape(n, oh, ow, 128)

    cols, (n, oh, ow) = _im2col_nhwc(h, 4, 1, 1)
    a = cols @ flat_w(p["w3"]) + p["b3"][None, :]
    h = jax.nn.sigmoid(a).reshape(n, oh, ow, 1)
    return jnp.transpose(h, (0, 3, 1, 2))


if __name__ == "__main__":
    key = jax.random.PRNGKey(0)
    kp, kx, ky = jax.random.split(key, 3)

    params = init_params(kp)
    kparams = prepare_kernel_params(params)

    x = jax.random.normal(kx, (2, 2, 16, 16), jnp.float32)
    y = jax.random.normal(ky, (2, 2, 16, 16), jnp.float32)

    out = discriminator_forward(kparams, x, y)
    out = jax.block_until_ready(out)

    assert out.shape == (2, 1, 3, 3), out.shape
    assert bool(jnp.all(jnp.isfinite(out)))
    assert bool(jnp.all((out >= 0.0) & (out <= 1.0)))     # sigmoid range

    # Check against a pure-JAX f32 reference (bf16 matmuls -> loose tolerance).
    ref = _reference_forward(params, x, y)
    max_err = float(jnp.max(jnp.abs(out - ref)))
    assert max_err < 5e-2, max_err

    print("KERNEL_OK")
</pallas_src>

<mosaic_0001>
module attributes {stable_mosaic.version = 11 : i64} {
  func.func @kernel(%arg0: memref<128x128xbf16, #tpu.memory_space<vmem>>, %arg1: memref<128x128xbf16, #tpu.memory_space<vmem>>, %arg2: memref<1x128xf32, #tpu.memory_space<vmem>>, %arg3: memref<2048x128xbf16, #tpu.memory_space<vmem>>, %arg4: memref<1x128xf32, #tpu.memory_space<vmem>>, %arg5: memref<1x128xf32, #tpu.memory_space<vmem>>, %arg6: memref<1x128xf32, #tpu.memory_space<vmem>>, %arg7: memref<2048x128xbf16, #tpu.memory_space<vmem>>, %arg8: memref<1x128xf32, #tpu.memory_space<vmem>>, %arg9: memref<18x128xf32, #tpu.memory_space<vmem>>) attributes {dimension_semantics = [], scalar_prefetch = 0 : i64, scratch_operands = 0 : i64, tpu.core_type = #tpu.core_type<tc>} {
    %c0 = arith.constant 0 : index
    %c0_0 = arith.constant 0 : index
    %0 = vector.load %arg0[%c0, %c0_0] : memref<128x128xbf16, #tpu.memory_space<vmem>>, vector<128x128xbf16>
    %c0_1 = arith.constant 0 : index
    %c0_2 = arith.constant 0 : index
    %1 = vector.load %arg1[%c0_1, %c0_2] : memref<128x128xbf16, #tpu.memory_space<vmem>>, vector<128x128xbf16>
    %cst = arith.constant dense<0.000000e+00> : vector<128x128xf32>
    %2 = tpu.matmul %0, %1, %cst {dimension_numbers = #tpu.dot_dimension_numbers<[1], [0], [0], [1], [0, 0, 1, 1], [], []>} : vector<128x128xbf16>, vector<128x128xbf16>, vector<128x128xf32> -> vector<128x128xf32>
    %c0_3 = arith.constant 0 : index
    %c0_4 = arith.constant 0 : index
    %3 = vector.load %arg2[%c0_3, %c0_4] : memref<1x128xf32, #tpu.memory_space<vmem>>, vector<1x128xf32>
    %4 = vector.broadcast %3 : vector<1x128xf32> to vector<128x128xf32>
    %5 = arith.addf %2, %4 : vector<128x128xf32>
    %cst_5 = arith.constant 2.000000e-01 : f32
    %6 = vector.broadcast %cst_5 : f32 to vector<128x128xf32>
    %7 = arith.mulf %6, %5 : vector<128x128xf32>
    %8 = arith.maximumf %5, %7 : vector<128x128xf32>
    %9 = arith.truncf %8 : vector<128x128xf32> to vector<128x128xbf16>
    %10 = vector.shape_cast %9 : vector<128x128xbf16> to vector<8x8x2x128xbf16>
    %cst_6 = arith.constant 0.000000e+00 : bf16
    %11 = vector.broadcast %cst_6 : bf16 to vector<8x1x2x128xbf16>
    %12 = tpu.concatenate %11, %10, %11 in 1 : vector<8x1x2x128xbf16>, vector<8x8x2x128xbf16>, vector<8x1x2x128xbf16> -> vector<8x10x2x128xbf16>
    %cst_7 = arith.constant 0.000000e+00 : bf16
    %13 = vector.broadcast %cst_7 : bf16 to vector<1x10x2x128xbf16>
    %14 = tpu.concatenate %13, %12, %13 in 0 : vector<1x10x2x128xbf16>, vector<8x10x2x128xbf16>, vector<1x10x2x128xbf16> -> vector<10x10x2x128xbf16>
    %15 = vector.shape_cast %14 : vector<10x10x2x128xbf16> to vector<5x2x10x2x128xbf16>
    %16 = vector.extract_strided_slice %15 {offsets = [0, 0, 0, 0, 0], sizes = [5, 1, 10, 2, 128], strides = [1, 1, 1, 1, 1]} : vector<5x2x10x2x128xbf16> to vector<5x1x10x2x128xbf16>
    %17 = vector.shape_cast %16 : vector<5x1x10x2x128xbf16> to vector<5x10x2x128xbf16>
    %18 = vector.shape_cast %17 : vector<5x10x2x128xbf16> to vector<5x5x2x2x128xbf16>
    %19 = vector.extract_strided_slice %18 {offsets = [0, 0, 0, 0, 0], sizes = [5, 5, 1, 2, 128], strides = [1, 1, 1, 1, 1]} : vector<5x5x2x2x128xbf16> to vector<5x5x1x2x128xbf16>
    %20 = vector.shape_cast %19 : vector<5x5x1x2x128xbf16> to vector<5x5x2x128xbf16>
    %21 = vector.extract_strided_slice %18 {offsets = [0, 0, 1, 0, 0], sizes = [5, 5, 1, 2, 128], strides = [1, 1, 1, 1, 1]} : vector<5x5x2x2x128xbf16> to vector<5x5x1x2x128xbf16>
    %22 = vector.shape_cast %21 : vector<5x5x1x2x128xbf16> to vector<5x5x2x128xbf16>
    %23 = vector.extract_strided_slice %15 {offsets = [0, 1, 0, 0, 0], sizes = [5, 1, 10, 2, 128], strides = [1, 1, 1, 1, 1]} : vector<5x2x10x2x128xbf16> to vector<5x1x10x2x128xbf16>
    %24 = vector.shape_cast %23 : vector<5x1x10x2x128xbf16> to vector<5x10x2x128xbf16>
    %25 = vector.shape_cast %24 : vector<5x10x2x128xbf16> to vector<5x5x2x2x128xbf16>
    %26 = vector.extract_strided_slice %25 {offsets = [0, 0, 0, 0, 0], sizes = [5, 5, 1, 2, 128], strides = [1, 1, 1, 1, 1]} : vector<5x5x2x2x128xbf16> to vector<5x5x1x2x128xbf16>
    %27 = vector.shape_cast %26 : vector<5x5x1x2x128xbf16> to vector<5x5x2x128xbf16>
    %28 = vector.extract_strided_slice %25 {offsets = [0, 0, 1, 0, 0], sizes = [5, 5, 1, 2, 128], strides = [1, 1, 1, 1, 1]} : vector<5x5x2x2x128xbf16> to vector<5x5x1x2x128xbf16>
    %29 = vector.shape_cast %28 : vector<5x5x1x2x128xbf16> to vector<5x5x2x128xbf16>
    %30 = vector.extract_strided_slice %20 {offsets = [0, 0, 0, 0], sizes = [4, 4, 2, 128], strides = [1, 1, 1, 1]} : vector<5x5x2x128xbf16> to vector<4x4x2x128xbf16>
    %31 = vector.extract_strided_slice %22 {offsets = [0, 0, 0, 0], sizes = [4, 4, 2, 128], strides = [1, 1, 1, 1]} : vector<5x5x2x128xbf16> to vector<4x4x2x128xbf16>
    %32 = vector.extract_strided_slice %20 {offsets = [0, 1, 0, 0], sizes = [4, 4, 2, 128], strides = [1, 1, 1, 1]} : vector<5x5x2x128xbf16> to vector<4x4x2x128xbf16>
    %33 = vector.extract_strided_slice %22 {offsets = [0, 1, 0, 0], sizes = [4, 4, 2, 128], strides = [1, 1, 1, 1]} : vector<5x5x2x128xbf16> to vector<4x4x2x128xbf16>
    %34 = vector.extract_strided_slice %27 {offsets = [0, 0, 0, 0], sizes = [4, 4, 2, 128], strides = [1, 1, 1, 1]} : vector<5x5x2x128xbf16> to vector<4x4x2x128xbf16>
    %35 = vector.extract_strided_slice %29 {offsets = [0, 0, 0, 0], sizes = [4, 4, 2, 128], strides = [1, 1, 1, 1]} : vector<5x5x2x128xbf16> to vector<4x4x2x128xbf16>
    %36 = vector.extract_strided_slice %27 {offsets = [0, 1, 0, 0], sizes = [4, 4, 2, 128], strides = [1, 1, 1, 1]} : vector<5x5x2x128xbf16> to vector<4x4x2x128xbf16>
    %37 = vector.extract_strided_slice %29 {offsets = [0, 1, 0, 0], sizes = [4, 4, 2, 128], strides = [1, 1, 1, 1]} : vector<5x5x2x128xbf16> to vector<4x4x2x128xbf16>
    %38 = vector.extract_strided_slice %20 {offsets = [1, 0, 0, 0], sizes = [4, 4, 2, 128], strides = [1, 1, 1, 1]} : vector<5x5x2x128xbf16> to vector<4x4x2x128xbf16>
    %39 = vector.extract_strided_slice %22 {offsets = [1, 0, 0, 0], sizes = [4, 4, 2, 128], strides = [1, 1, 1, 1]} : vector<5x5x2x128xbf16> to vector<4x4x2x128xbf16>
    %40 = vector.extract_strided_slice %20 {offsets = [1, 1, 0, 0], sizes = [4, 4, 2, 128], strides = [1, 1, 1, 1]} : vector<5x5x2x128xbf16> to vector<4x4x2x128xbf16>
    %41 = vector.extract_strided_slice %22 {offsets = [1, 1, 0, 0], sizes = [4, 4, 2, 128], strides = [1, 1, 1, 1]} : vector<5x5x2x128xbf16> to vector<4x4x2x128xbf16>
    %42 = vector.extract_strided_slice %27 {offsets = [1, 0, 0, 0], sizes = [4, 4, 2, 128], strides = [1, 1, 1, 1]} : vector<5x5x2x128xbf16> to vector<4x4x2x128xbf16>
    %43 = vector.extract_strided_slice %29 {offsets = [1, 0, 0, 0], sizes = [4, 4, 2, 128], strides = [1, 1, 1, 1]} : vector<5x5x2x128xbf16> to vector<4x4x2x128xbf16>
    %44 = vector.extract_strided_slice %27 {offsets = [1, 1, 0, 0], sizes = [4, 4, 2, 128], strides = [1, 1, 1, 1]} : vector<5x5x2x128xbf16> to vector<4x4x2x128xbf16>
    %45 = vector.extract_strided_slice %29 {offsets = [1, 1, 0, 0], sizes = [4, 4, 2, 128], strides = [1, 1, 1, 1]} : vector<5x5x2x128xbf16> to vector<4x4x2x128xbf16>
    %46 = tpu.concatenate %30, %31, %32, %33, %34, %35, %36, %37, %38, %39, %40, %41, %42, %43, %44, %45 in 3 : vector<4x4x2x128xbf16>, vector<4x4x2x128xbf16>, vector<4x4x2x128xbf16>, vector<4x4x2x128xbf16>, vector<4x4x2x128xbf16>, vector<4x4x2x128xbf16>, vector<4x4x2x128xbf16>, vector<4x4x2x128xbf16>, vector<4x4x2x128xbf16>, vector<4x4x2x128xbf16>, vector<4x4x2x128xbf16>, vector<4x4x2x128xbf16>, vector<4x4x2x128xbf16>, vector<4x4x2x128xbf16>, vector<4x4x2x128xbf16>, vector<4x4x2x128xbf16> -> vector<4x4x2x2048xbf16>
    %47 = vector.shape_cast %46 : vector<4x4x2x2048xbf16> to vector<32x2048xbf16>
    %c0_8 = arith.constant 0 : index
    %c0_9 = arith.constant 0 : index
    %48 = vector.load %arg3[%c0_8, %c0_9] : memref<2048x128xbf16, #tpu.memory_space<vmem>>, vector<2048x128xbf16>
    %cst_10 = arith.constant dense<0.000000e+00> : vector<32x128xf32>
    %49 = tpu.matmul %47, %48, %cst_10 {dimension_numbers = #tpu.dot_dimension_numbers<[1], [0], [0], [1], [0, 0, 1, 1], [], []>} : vector<32x2048xbf16>, vector<2048x128xbf16>, vector<32x128xf32> -> vector<32x128xf32>
    %c0_11 = arith.constant 0 : index
    %c0_12 = arith.constant 0 : index
    %50 = vector.load %arg4[%c0_11, %c0_12] : memref<1x128xf32, #tpu.memory_space<vmem>>, vector<1x128xf32>
    %51 = vector.broadcast %50 : vector<1x128xf32> to vector<32x128xf32>
    %52 = arith.addf %49, %51 : vector<32x128xf32>
    %cst_13 = arith.constant dense<0.000000e+00> : vector<128xf32>
    %53 = vector.multi_reduction <add>, %52, %cst_13 [0] : vector<32x128xf32> to vector<128xf32>
    %54 = vector.shape_cast %53 : vector<128xf32> to vector<1x128xf32>
    %cst_14 = arith.constant 3.200000e+01 : f32
    %55 = vector.broadcast %cst_14 : f32 to vector<1x128xf32>
    %56 = arith.divf %54, %55 : vector<1x128xf32>
    %57 = arith.mulf %52, %52 : vector<32x128xf32>
    %cst_15 = arith.constant dense<0.000000e+00> : vector<128xf32>
    %58 = vector.multi_reduction <add>, %57, %cst_15 [0] : vector<32x128xf32> to vector<128xf32>
    %59 = vector.shape_cast %58 : vector<128xf32> to vector<1x128xf32>
    %cst_16 = arith.constant 3.200000e+01 : f32
    %60 = vector.broadcast %cst_16 : f32 to vector<1x128xf32>
    %61 = arith.divf %59, %60 : vector<1x128xf32>
    %62 = arith.mulf %56, %56 : vector<1x128xf32>
    %63 = arith.subf %61, %62 : vector<1x128xf32>
    %cst_17 = arith.constant 0.000000e+00 : f32
    %64 = vector.broadcast %cst_17 : f32 to vector<1x128xf32>
    %65 = arith.maximumf %63, %64 : vector<1x128xf32>
    %66 = vector.broadcast %56 : vector<1x128xf32> to vector<32x128xf32>
    %67 = arith.subf %52, %66 : vector<32x128xf32>
    %cst_18 = arith.constant 9.99999974E-6 : f32
    %68 = vector.broadcast %cst_18 : f32 to vector<1x128xf32>
    %69 = arith.addf %65, %68 : vector<1x128xf32>
    %70 = math.rsqrt %69 : vector<1x128xf32>
    %71 = vector.broadcast %70 : vector<1x128xf32> to vector<32x128xf32>
    %72 = arith.mulf %67, %71 : vector<32x128xf32>
    %c0_19 = arith.constant 0 : index
    %c0_20 = arith.constant 0 : index
    %73 = vector.load %arg5[%c0_19, %c0_20] : memref<1x128xf32, #tpu.memory_space<vmem>>, vector<1x128xf32>
    %74 = vector.broadcast %73 : vector<1x128xf32> to vector<32x128xf32>
    %75 = arith.mulf %72, %74 : vector<32x128xf32>
    %c0_21 = arith.constant 0 : index
    %c0_22 = arith.constant 0 : index
    %76 = vector.load %arg6[%c0_21, %c0_22] : memref<1x128xf32, #tpu.memory_space<vmem>>, vector<1x128xf32>
    %77 = vector.broadcast %76 : vector<1x128xf32> to vector<32x128xf32>
    %78 = arith.addf %75, %77 : vector<32x128xf32>
    %cst_23 = arith.constant 2.000000e-01 : f32
    %79 = vector.broadcast %cst_23 : f32 to vector<32x128xf32>
    %80 = arith.mulf %79, %78 : vector<32x128xf32>
    %81 = arith.maximumf %78, %80 : vector<32x128xf32>
    %82 = arith.truncf %81 : vector<32x128xf32> to vector<32x128xbf16>
    %83 = vector.shape_cast %82 : vector<32x128xbf16> to vector<4x4x2x128xbf16>
    %cst_24 = arith.constant 0.000000e+00 : bf16
    %84 = vector.broadcast %cst_24 : bf16 to vector<4x1x2x128xbf16>
    %85 = tpu.concatenate %84, %83, %84 in 1 : vector<4x1x2x128xbf16>, vector<4x4x2x128xbf16>, vector<4x1x2x128xbf16> -> vector<4x6x2x128xbf16>
    %cst_25 = arith.constant 0.000000e+00 : bf16
    %86 = vector.broadcast %cst_25 : bf16 to vector<1x6x2x128xbf16>
    %87 = tpu.concatenate %86, %85, %86 in 0 : vector<1x6x2x128xbf16>, vector<4x6x2x128xbf16>, vector<1x6x2x128xbf16> -> vector<6x6x2x128xbf16>
    %88 = vector.extract_strided_slice %87 {offsets = [0, 0, 0, 0], sizes = [3, 3, 2, 128], strides = [1, 1, 1, 1]} : vector<6x6x2x128xbf16> to vector<3x3x2x128xbf16>
    %89 = vector.extract_strided_slice %87 {offsets = [0, 1, 0, 0], sizes = [3, 3, 2, 128], strides = [1, 1, 1, 1]} : vector<6x6x2x128xbf16> to vector<3x3x2x128xbf16>
    %90 = vector.extract_strided_slice %87 {offsets = [0, 2, 0, 0], sizes = [3, 3, 2, 128], strides = [1, 1, 1, 1]} : vector<6x6x2x128xbf16> to vector<3x3x2x128xbf16>
    %91 = vector.extract_strided_slice %87 {offsets = [0, 3, 0, 0], sizes = [3, 3, 2, 128], strides = [1, 1, 1, 1]} : vector<6x6x2x128xbf16> to vector<3x3x2x128xbf16>
    %92 = vector.extract_strided_slice %87 {offsets = [1, 0, 0, 0], sizes = [3, 3, 2, 128], strides = [1, 1, 1, 1]} : vector<6x6x2x128xbf16> to vector<3x3x2x128xbf16>
    %93 = vector.extract_strided_slice %87 {offsets = [1, 1, 0, 0], sizes = [3, 3, 2, 128], strides = [1, 1, 1, 1]} : vector<6x6x2x128xbf16> to vector<3x3x2x128xbf16>
    %94 = vector.extract_strided_slice %87 {offsets = [1, 2, 0, 0], sizes = [3, 3, 2, 128], strides = [1, 1, 1, 1]} : vector<6x6x2x128xbf16> to vector<3x3x2x128xbf16>
    %95 = vector.extract_strided_slice %87 {offsets = [1, 3, 0, 0], sizes = [3, 3, 2, 128], strides = [1, 1, 1, 1]} : vector<6x6x2x128xbf16> to vector<3x3x2x128xbf16>
    %96 = vector.extract_strided_slice %87 {offsets = [2, 0, 0, 0], sizes = [3, 3, 2, 128], strides = [1, 1, 1, 1]} : vector<6x6x2x128xbf16> to vector<3x3x2x128xbf16>
    %97 = vector.extract_strided_slice %87 {offsets = [2, 1, 0, 0], sizes = [3, 3, 2, 128], strides = [1, 1, 1, 1]} : vector<6x6x2x128xbf16> to vector<3x3x2x128xbf16>
    %98 = vector.extract_strided_slice %87 {offsets = [2, 2, 0, 0], sizes = [3, 3, 2, 128], strides = [1, 1, 1, 1]} : vector<6x6x2x128xbf16> to vector<3x3x2x128xbf16>
    %99 = vector.extract_strided_slice %87 {offsets = [2, 3, 0, 0], sizes = [3, 3, 2, 128], strides = [1, 1, 1, 1]} : vector<6x6x2x128xbf16> to vector<3x3x2x128xbf16>
    %100 = vector.extract_strided_slice %87 {offsets = [3, 0, 0, 0], sizes = [3, 3, 2, 128], strides = [1, 1, 1, 1]} : vector<6x6x2x128xbf16> to vector<3x3x2x128xbf16>
    %101 = vector.extract_strided_slice %87 {offsets = [3, 1, 0, 0], sizes = [3, 3, 2, 128], strides = [1, 1, 1, 1]} : vector<6x6x2x128xbf16> to vector<3x3x2x128xbf16>
    %102 = vector.extract_strided_slice %87 {offsets = [3, 2, 0, 0], sizes = [3, 3, 2, 128], strides = [1, 1, 1, 1]} : vector<6x6x2x128xbf16> to vector<3x3x2x128xbf16>
    %103 = vector.extract_strided_slice %87 {offsets = [3, 3, 0, 0], sizes = [3, 3, 2, 128], strides = [1, 1, 1, 1]} : vector<6x6x2x128xbf16> to vector<3x3x2x128xbf16>
    %104 = tpu.concatenate %88, %89, %90, %91, %92, %93, %94, %95, %96, %97, %98, %99, %100, %101, %102, %103 in 3 : vector<3x3x2x128xbf16>, vector<3x3x2x128xbf16>, vector<3x3x2x128xbf16>, vector<3x3x2x128xbf16>, vector<3x3x2x128xbf16>, vector<3x3x2x128xbf16>, vector<3x3x2x128xbf16>, vector<3x3x2x128xbf16>, vector<3x3x2x128xbf16>, vector<3x3x2x128xbf16>, vector<3x3x2x128xbf16>, vector<3x3x2x128xbf16>, vector<3x3x2x128xbf16>, vector<3x3x2x128xbf16>, vector<3x3x2x128xbf16>, vector<3x3x2x128xbf16> -> vector<3x3x2x2048xbf16>
    %105 = vector.shape_cast %104 : vector<3x3x2x2048xbf16> to vector<18x2048xbf16>
    %c0_26 = arith.constant 0 : index
    %c0_27 = arith.constant 0 : index
    %106 = vector.load %arg7[%c0_26, %c0_27] : memref<2048x128xbf16, #tpu.memory_space<vmem>>, vector<2048x128xbf16>
    %cst_28 = arith.constant dense<0.000000e+00> : vector<18x128xf32>
    %107 = tpu.matmul %105, %106, %cst_28 {dimension_numbers = #tpu.dot_dimension_numbers<[1], [0], [0], [1], [0, 0, 1, 1], [], []>} : vector<18x2048xbf16>, vector<2048x128xbf16>, vector<18x128xf32> -> vector<18x128xf32>
    %c0_29 = arith.constant 0 : index
    %c0_30 = arith.constant 0 : index
    %108 = vector.load %arg8[%c0_29, %c0_30] : memref<1x128xf32, #tpu.memory_space<vmem>>, vector<1x128xf32>
    %109 = vector.broadcast %108 : vector<1x128xf32> to vector<18x128xf32>
    %110 = arith.addf %107, %109 : vector<18x128xf32>
    %111 = arith.negf %110 : vector<18x128xf32>
    %112 = math.exp %111 : vector<18x128xf32>
    %cst_31 = arith.constant 1.000000e+00 : f32
    %113 = vector.broadcast %cst_31 : f32 to vector<18x128xf32>
    %114 = arith.addf %113, %112 : vector<18x128xf32>
    %115 = arith.divf %113, %114 : vector<18x128xf32>
    %c0_32 = arith.constant 0 : index
    %c0_33 = arith.constant 0 : index
    %116 = vector.load %arg9[%c0_32, %c0_33] : memref<18x128xf32, #tpu.memory_space<vmem>>, vector<18x128xf32>
    tpu.vector_store %arg9[%c0_32, %c0_33], %115 {strides = array<i32>} : memref<18x128xf32, #tpu.memory_space<vmem>>, vector<18x128xf32>,
    return
  }
}

</mosaic_0001>

<bundles_post_ra>
// kernel: squeeze.1
= control target key start
LH: loop header
LB: loop body
LE: loop exit
PB: predicated region body
PF: predicated region fallthrough
CT: control target
= control target key end

     0   :  { %s86_s8 = smov 126   ;;  %vm7_vm0 = vcmask 15360   ;;  %s87_s9 = smov 120   ;;  %s124_s0 = inlined_call_operand.vmem [shape: f32[18], index: 0, kind: input, shape index: {}]   ;;  %s125_s1 = inlined_call_operand.vmem [shape: f32[3,3,2], index: 1, kind: output, shape index: {}]  }
   0x1   :  { %v4_v0 = vld [vmem:[%s124_s0] sm:$0x1]  ;;  %s85_s0 = smov 122   ;;  %s88_s10 = smov 124  }
   0x2   :  { %5 = vst [vmem:[#allocation1] sm:$0x1] %v4_v0  ;;  %s89_s11 = smov 116   ;;  %s90_s12 = smov 118  }
   0x3   :  { %s91_s13 = smov 112   ;;  %s92_s14 = smov 114  }
   0x9   :  { %v21_v1 = vld [vmem:[#allocation1] sm:$0x1]  }
   0xa   :  { %v9_v2 = vld [vmem:[#allocation1] sm:$0x1]   ;;  %22 = vrot.lane.b32.xlu1 %v21_v1, %s85_s0 }
   0xb   :  { %10 = vrot.lane.b32.xlu0 %v9_v2, %s86_s8  ;;  %v27_v3 = vld [vmem:[#allocation1] sm:$0x1]  }
   0xc   :  { %v15_v4 = vld [vmem:[#allocation1] sm:$0x1]  }
   0xd   :  { %v6_v5 = vld [vmem:[#allocation1] sm:$0x1]  }
   0xe   :  { %8 = vst.msk [vmem:[#allocation0] sm:$0x1] %vm7_vm0, %v6_v5   ;;  %28 = vrot.lane.b32.xlu1 %v27_v3, %s87_s9  ;;  %v39_v6 = vld [vmem:[#allocation1] sm:$0x1]  }
   0xf   :  { %16 = vrot.lane.b32.xlu0 %v15_v4, %s88_s10  ;;  %v33_v7 = vld [vmem:[#allocation1] sm:$0x1]  }
  0x10   :  { %v51_v8 = vld [vmem:[#allocation1] sm:$0x1]  }
  0x11   :  { %v45_v9 = vld [vmem:[#allocation1] sm:$0x1]  }
  0x12   :  { %40 = vrot.lane.b32.xlu1 %v39_v6, %s89_s11 }
  0x13   :  { %34 = vrot.lane.b32.xlu0 %v33_v7, %s90_s12 }
  0x16   :  { %52 = vrot.lane.b32.xlu1 %v51_v8, %s91_s13 }
  0x17   :  { %46 = vrot.lane.b32.xlu0 %v45_v9, %s92_s14 }
  0x7c   :  { %v23_v10 = vpop.permute.xlu1 %22  }
  0x7d   :  { %v11_v11 = vpop.permute.xlu0 %10   ;;  %26 = vst.msk [vmem:[#allocation0 + $0x8] sm:$0x1] %vm7_vm0, %v23_v10  }
  0x7e   :  { %14 = vst.msk [vmem:[#allocation0 + $0x1] sm:$0x1] %vm7_vm0, %v11_v11  }
  0x80   :  { %v29_v12 = vpop.permute.xlu1 %28  }
  0x81   :  { %v17_v13 = vpop.permute.xlu0 %16   ;;  %32 = vst.msk [vmem:[#allocation0 + $0x9] sm:$0x1] %vm7_vm0, %v29_v12  }
  0x82   :  { %20 = vst.msk [vmem:[#allocation0 + $0x2] sm:$0x1] %vm7_vm0, %v17_v13  }
  0x84   :  { %v41_v14 = vpop.permute.xlu1 %40  }
  0x85   :  { %v35_v15 = vpop.permute.xlu0 %34   ;;  %44 = vst.msk [vmem:[#allocation0 + $0x10] sm:$0x1] %vm7_vm0, %v41_v14  }
  0x86   :  { %38 = vst.msk [vmem:[#allocation0 + $0xa] sm:$0x1] %vm7_vm0, %v35_v15  }
  0x88   :  { %v53_v17 = vpop.permute.xlu1 %52  }
  0x89   :  { %v60_v16 = vld [vmem:[#allocation0] sm:$0xf]  ;;  %v47_v18 = vpop.permute.xlu0 %46   ;;  %56 = vst.msk [vmem:[#allocation0 + $0x12] sm:$0x1] %vm7_vm0, %v53_v17  }
  0x8a   :  { %62 = vst [vmem:[%s125_s1] sm:$0xf] %v60_v16  ;;  %50 = vst.msk [vmem:[#allocation0 + $0x11] sm:$0x1] %vm7_vm0, %v47_v18  }
  0x8d   :  { %v64_v19 = vld [vmem:[#allocation0 + $0x8] sm:$0xf] }
  0x8e   :  { %75 = vst [vmem:[%s125_s1 + $0x4] sm:$0xf] %v64_v19 }
  0x91   :  { %v69_v20 = vld [vmem:[#allocation0 + $0x10] sm:$0xf] }
  0x92   :  { %76 = vst [vmem:[%s125_s1 + $0x8] sm:$0xf] %v69_v20 }

// kernel: discriminator_forward.1
= control target key start
LH: loop header
LB: loop body
LE: loop exit
PB: predicated region body
PF: predicated region fallthrough
CT: control target
= control target key end

     0   :  { %v6522_v50 = vmov 1966171168   ;;  %v317_v52 = vlaneseq  ;;  %v6523_v55 = vmov 0   ;;  %s8243_s1 = inlined_call_operand.vmem [shape: bf16[128,128], index: 1, kind: input, shape index: {}]   ;;  %s8244_s0 = inlined_call_operand.vmem [shape: bf16[128,128], index: 0, kind: input, shape index: {}]   ;;  %s8245_s3 = inlined_call_operand.vmem [shape: bf16[2048,128], index: 3, kind: input, shape index: {}]   ;;  %s8246_s2 = inlined_call_operand.vmem [shape: f32[1,128], index: 2, kind: input, shape index: {}]   ;;  %s8247_s4 = inlined_call_operand.vmem [shape: f32[1,128], index: 4, kind: input, shape index: {}]   ;;  %s8248_s7 = inlined_call_operand.vmem [shape: bf16[2048,128], index: 7, kind: input, shape index: {}]   ;;  %s8249_s5 = inlined_call_operand.vmem [shape: f32[1,128], index: 5, kind: input, shape index: {}]   ;;  %s8250_s6 = inlined_call_operand.vmem [shape: f32[1,128], index: 6, kind: input, shape index: {}]   ;;  %s8251_s8 = inlined_call_operand.vmem [shape: f32[1,128], index: 8, kind: input, shape index: {}]   ;;  %s8252_s9 = inlined_call_operand.vmem [shape: f32[18,128], index: 9, kind: output, shape index: {}]  }
   0x1   :  { %v6236_v0 = vld [vmem:[%s8243_s1] sm:$0xff]   ;;  %v6237_v1 = vld [vmem:[%s8243_s1 + $0x8] sm:$0xff]   ;;  %v6238_v2 = vld [vmem:[%s8243_s1 + $0x10] sm:$0xff]   ;;  %v315_v51 = vunpack.c.l.s4 %v6522_v50  ;;  %v706_v56 = vcombine.low %v6523_v55, %v6523_v55 }
   0x2   :  { %6186 = vmatprep.subr.bf16.mxu0 %v6236_v0  ;;  %v6239_v3 = vld [vmem:[%s8243_s1 + $0x18] sm:$0xff]   ;;  %v6244_v4 = vld [vmem:[%s8244_s0] sm:$0xff]   ;;  %v6241_v6 = vld [vmem:[%s8243_s1 + $0x28] sm:$0xff]   ;;  %v318_v54 = vshrl.u32 %v317_v52, 7 }
   0x3   :  { %6187 = vmatpush3.bf16.msra.mxu0 %v6236_v0  ;;  %6202 = vmatprep.mubr.bf16.mxu0 %v6244_v4  ;;  %v6240_v5 = vld [vmem:[%s8243_s1 + $0x20] sm:$0xff]   ;;  %v6242_v7 = vld [vmem:[%s8243_s1 + $0x30] sm:$0xff]   ;;  %v6243_v8 = vld [vmem:[%s8243_s1 + $0x38] sm:$0xff]   ;;  %v316_v53 = vunpack.c.0.s8 %v315_v51 }
   0x4   :  { %6188 = vmatprep.subr.bf16.mxu0 %v6237_v1  ;;  %v6245_v9 = vld [vmem:[%s8244_s0 + $0x8] sm:$0xff]   ;;  %v6246_v10 = vld [vmem:[%s8244_s0 + $0x10] sm:$0xff]   ;;  %v6247_v11 = vld [vmem:[%s8244_s0 + $0x18] sm:$0xff]  }
   0x5   :  { %v6248_v12 = vld [vmem:[%s8244_s0 + $0x20] sm:$0xff]   ;;  %v6249_v13 = vld [vmem:[%s8244_s0 + $0x28] sm:$0xff]   ;;  %v6250_v14 = vld [vmem:[%s8244_s0 + $0x30] sm:$0xff]   ;;  %v6726_v57 = vsub.s32 %v316_v53, %v318_v54 }
   0x6   :  { %v6251_v15 = vld [vmem:[%s8244_s0 + $0x38] sm:$0xff]   ;;  %v6252_v16 = vld [vmem:[%s8245_s3 + $0x40] sm:$0xff]   ;;  %v6256_v20 = vld [vmem:[%s8245_s3 + $0x48] sm:$0xff]  }
   0x7   :  { %6189 = vmatpush3.bf16.msra.mxu0 %v6237_v1  ;;  %v6253_v17 = vld [vmem:[%s8245_s3 + $0xc0] sm:$0xff]   ;;  %5738 = vmatprep.subr.bf16.mxu1 %v6252_v16  ;;  %v6257_v21 = vld [vmem:[%s8245_s3 + $0xc8] sm:$0xff]   ;;  %v6260_v24 = vld [vmem:[%s8245_s3 + $0x50] sm:$0xff]   ;;  %v715_v58 = vrot.slane %v706_v56, %v6726_v57 }
   0x8   :  { %6190 = vmatprep.subr.bf16.mxu0 %v6238_v2  ;;  %v6254_v18 = vld [vmem:[%s8245_s3] sm:$0xff]   ;;  %v6258_v22 = vld [vmem:[%s8245_s3 + $0x8] sm:$0xff]   ;;  %v6261_v25 = vld [vmem:[%s8245_s3 + $0xd0] sm:$0xff]  }
   0x9   :  { %v6255_v19 = vld [vmem:[%s8245_s3 + $0x80] sm:$0xff]   ;;  %5739 = vmatpush3.bf16.msra.mxu1 %v6254_v18  ;;  %v6259_v23 = vld [vmem:[%s8245_s3 + $0x88] sm:$0xff]   ;;  %v6262_v26 = vld [vmem:[%s8245_s3 + $0x10] sm:$0xff]   ;;  %v730_v59 = vcombine.low %v715_v58, %v715_v58 }
   0xa   :  { %5740 = vmatprep.subr.bf16.mxu1 %v6256_v20  ;;  %v6263_v27 = vld [vmem:[%s8245_s3 + $0x90] sm:$0xff]   ;;  %v6264_v28 = vld [vmem:[%s8245_s3 + $0x58] sm:$0xff]   ;;  %v6268_v32 = vld [vmem:[%s8245_s3 + $0x60] sm:$0xff]  }
   0xb   :  { %6191 = vmatpush3.bf16.msra.mxu0 %v6238_v2  ;;  %v6265_v29 = vld [vmem:[%s8245_s3 + $0xd8] sm:$0xff]   ;;  %v6269_v33 = vld [vmem:[%s8245_s3 + $0xe0] sm:$0xff]   ;;  %v6272_v36 = vld [vmem:[%s8245_s3 + $0x68] sm:$0xff]   ;;  %v6730_v60 = vrot.slane %v730_v59, %v6726_v57 }
   0xc   :  { %6192 = vmatprep.subr.bf16.mxu0 %v6239_v3  ;;  %v6266_v30 = vld [vmem:[%s8245_s3 + $0x18] sm:$0xff]   ;;  %v6270_v34 = vld [vmem:[%s8245_s3 + $0x20] sm:$0xff]   ;;  %v6273_v37 = vld [vmem:[%s8245_s3 + $0xe8] sm:$0xff]  }
   0xd   :  { %5741 = vmatpush3.bf16.msra.mxu1 %v6258_v22  ;;  %v6267_v31 = vld [vmem:[%s8245_s3 + $0x98] sm:$0xff]   ;;  %v6271_v35 = vld [vmem:[%s8245_s3 + $0xa0] sm:$0xff]   ;;  %v6274_v38 = vld [vmem:[%s8245_s3 + $0x28] sm:$0xff]   ;;  %v5418_v61 = vcombine.low %v6730_v60, %v6730_v60 }
   0xe   :  { %5742 = vmatprep.subr.bf16.mxu1 %v6260_v24  ;;  %v6275_v39 = vld [vmem:[%s8245_s3 + $0xa8] sm:$0xff]   ;;  %v6276_v40 = vld [vmem:[%s8245_s3 + $0x70] sm:$0xff]   ;;  %v6280_v44 = vld [vmem:[%s8245_s3 + $0x78] sm:$0xff]  }
   0xf   :  { %6193 = vmatpush3.bf16.msra.mxu0 %v6239_v3  ;;  %v6277_v41 = vld [vmem:[%s8245_s3 + $0xf0] sm:$0xff]   ;;  %v6281_v45 = vld [vmem:[%s8245_s3 + $0xf8] sm:$0xff]   ;;  %v6284_v48 = vld [vmem:[%s8245_s3 + $0x140] sm:$0xff]   ;;  %v6741_v2 = vrot.slane %v5418_v61, %v6726_v57 }
  0x10   :  { %6194 = vmatprep.subr.bf16.mxu0 %v6240_v5  ;;  %v6278_v42 = vld [vmem:[%s8245_s3 + $0x30] sm:$0xff]   ;;  %v6282_v46 = vld [vmem:[%s8245_s3 + $0x38] sm:$0xff]   ;;  %v6285_v49 = vld [vmem:[%s8245_s3 + $0x1c0] sm:$0xff]  }
  0x11   :  { %5743 = vmatpush3.bf16.msra.mxu1 %v6262_v26  ;;  %v6279_v43 = vld [vmem:[%s8245_s3 + $0xb0] sm:$0xff]   ;;  %v6283_v47 = vld [vmem:[%s8245_s3 + $0xb8] sm:$0xff]   ;;  %v6737_v62 = vld [vmem:[%s8246_s2] ss:$0 sm:$0xff] }
  0x12   :  { %5744 = vmatprep.subr.bf16.mxu1 %v6264_v28 }
  0x13   :  { %6195 = vmatpush3.bf16.msra.mxu0 %v6240_v5 }
  0x14   :  { %6196 = vmatprep.subr.bf16.mxu0 %v6241_v6 }
  0x15   :  { %5745 = vmatpush3.bf16.msra.mxu1 %v6266_v30 }
  0x16   :  { %5746 = vmatprep.subr.bf16.mxu1 %v6268_v32 }
  0x17   :  { %6197 = vmatpush3.bf16.msra.mxu0 %v6241_v6 }
  0x18   :  { %6198 = vmatprep.subr.bf16.mxu0 %v6242_v7 }
  0x19   :  { %5747 = vmatpush3.bf16.msra.mxu1 %v6270_v34 }
  0x1a   :  { %5748 = vmatprep.subr.bf16.mxu1 %v6272_v36 }
  0x1b   :  { %6199 = vmatpush3.bf16.msra.mxu0 %v6242_v7 }
  0x1c   :  { %6200 = vmatprep.subr.bf16.mxu0 %v6243_v8 }
  0x1d   :  { %5749 = vmatpush3.bf16.msra.mxu1 %v6274_v38 }
  0x1e   :  { %5750 = vmatprep.subr.bf16.mxu1 %v6276_v40 }
  0x1f   :  { %6201 = vmatpush3.bf16.msra.mxu0 %v6243_v8 }
  0x20   :  { %5766 = vmatprep.subr.bf16.mxu0 %v6253_v17 }
  0x21   :  { %5751 = vmatpush3.bf16.msra.mxu1 %v6278_v42 }
  0x22   :  { %6203 = vmatmul.mubr.bf16.vlgmr.msra.gmra.mrb[0].mxu0 %v6245_v9  ;;  %5752 = vmatprep.subr.bf16.mxu1 %v6280_v44 }
  0x23   :  { %6206 = vmatprep.mubr.bf16.mxu0 %v6246_v10  ;;  %5767 = vmatpush3.bf16.msra.mxu0 %v6255_v19 }
  0x24   :  { %5768 = vmatprep.subr.bf16.mxu0 %v6257_v21 }
  0x25   :  { %5753 = vmatpush3.bf16.msra.mxu1 %v6282_v46 }
  0x26   :  { %5794 = vmatprep.subr.bf16.mxu1 %v6284_v48 }
  0x27   :  { %5769 = vmatpush3.bf16.msra.mxu0 %v6259_v23 }
  0x28   :  { %5770 = vmatprep.subr.bf16.mxu0 %v6261_v25 }
  0x2a   :  { %6207 = vmatmul.mubr.bf16.gmra.mrb[4].mxu0 %v6247_v11  ;;  %v1646_v11 = vcombine.high %v6741_v2, %v6741_v2 }
  0x2b   :  { %6210 = vmatprep.mubr.bf16.mxu0 %v6248_v12  ;;  %5771 = vmatpush3.bf16.msra.mxu0 %v6263_v27 }
  0x2c   :  { %5772 = vmatprep.subr.bf16.mxu0 %v6265_v29  ;;  %v6754_v23 = vrot.slane %v1646_v11, %v6726_v57 }
  0x2f   :  { %5773 = vmatpush3.bf16.msra.mxu0 %v6267_v31 }
  0x30   :  { %5774 = vmatprep.subr.bf16.mxu0 %v6269_v33 }
  0x32   :  { %6211 = vmatmul.mubr.bf16.gmra.mrb[8].mxu0 %v6249_v13  ;;  %v1645_v13 = vcombine.low %v6741_v2, %v6741_v2 }
  0x33   :  { %6214 = vmatprep.mubr.bf16.mxu0 %v6250_v14  ;;  %5775 = vmatpush3.bf16.msra.mxu0 %v6271_v35 }
  0x34   :  { %5776 = vmatprep.subr.bf16.mxu0 %v6273_v37  ;;  %v6760_v28 = vrot.slane %v1645_v13, %v6726_v57 }
  0x37   :  { %5777 = vmatpush3.bf16.msra.mxu0 %v6275_v39 }
  0x38   :  { %5778 = vmatprep.subr.bf16.mxu0 %v6277_v41 }
  0x3a   :  { %6215 = vmatmul.mubr.bf16.gmra.mrb[12].mxu0 %v6251_v15 }
  0x3b   :  { %5779 = vmatpush3.bf16.msra.mxu0 %v6279_v43 }
  0x3c   :  { %5780 = vmatprep.subr.bf16.mxu0 %v6281_v45 }
  0x3f   :  { %5781 = vmatpush3.bf16.msra.mxu0 %v6283_v47 }
  0x40   :  { %5822 = vmatprep.subr.bf16.mxu0 %v6285_v49 }
  0xf5   :  { %v6204_v63 = vpop.f32.mrb[0].mxu0 }
  0xf6   :  { %v211_v0 = vadd.f32 %v6204_v63, %v6737_v62  ;;  %v202_v1 = vpop.f32.mrb[1].mxu0 }
  0xf7   :  { %v203_v3 = vadd.f32 %v6737_v62, %v202_v1  ;;  %v6205_v4 = vpop.f32.mrb[2].mxu0 }
  0xf8   :  { %v267_v5 = vmul.f32 0.2, %v211_v0  ;;  %v214_v6 = vadd.f32 %v6205_v4, %v6737_v62  ;;  %v205_v7 = vpop.f32.mrb[3].mxu0 }
  0xf9   :  { %v265_v8 = vmul.f32 0.2, %v203_v3  ;;  %v206_v9 = vadd.f32 %v6737_v62, %v205_v7 }
  0xfa   :  { %v268_v10 = vmul.f32 0.2, %v214_v6  ;;  %v283_v14 = vmax.f32 %v211_v0, %v267_v5 }
  0xfb   :  { %v266_v12 = vmul.f32 0.2, %v206_v9  ;;  %v281_v16 = vmax.f32 %v203_v3, %v265_v8 }
  0xfc   :  { %v284_v15 = vmax.f32 %v214_v6, %v268_v10 }
  0xfd   :  { %v282_v17 = vmax.f32 %v206_v9, %v266_v12  ;;  %v6208_v18 = vpop.f32.mrb[4].mxu0 }
  0xfe   :  { %v298_v19 = vpack.c.bf16 %v284_v15, %v283_v14  ;;  %v5410_v20 = vpack.c.bf16 %v284_v15, %v284_v15  ;;  %v6751_v21 = vadd.f32 %v6208_v18, %v6737_v62  ;;  %v218_v22 = vpop.f32.mrb[5].mxu0 }
  0xff   :  { %v297_v24 = vpack.c.bf16 %v282_v17, %v281_v16  ;;  %v5409_v25 = vpack.c.bf16 %v282_v17, %v282_v17  ;;  %v6757_v26 = vadd.f32 %v6737_v62, %v218_v22  ;;  %v6209_v27 = vpop.f32.mrb[6].mxu0 }
 0x100   :  { %v369_v29 = vrot.slane %v298_v19, %v6726_v57  ;;  %v376_v30 = vrot.slane %v5410_v20, %v6726_v57  ;;  %v6765_v31 = vmul.f32 0.2, %v6751_v21  ;;  %v6768_v32 = vadd.f32 %v6209_v27, %v6737_v62  ;;  %v221_v33 = vpop.f32.mrb[7].mxu0 }
 0x101   :  { %v320_v34 = vrot.slane %v297_v24, %v6726_v57  ;;  %v327_v35 = vrot.slane %v5409_v25, %v6726_v57  ;;  %v6773_v36 = vmul.f32 0.2, %v6757_v26  ;;  %v6776_v37 = vadd.f32 %v6737_v62, %v221_v33 }
 0x102   :  { %v377_v38 = vcombine.high %v369_v29, %v369_v29  ;;  %v378_v39 = vcombine.high %v376_v30, %v376_v30  ;;  %v385_v40 = vrot.slane %v369_v29, %v6726_v57  ;;  %v392_v41 = vrot.slane %v376_v30, %v6726_v57 }
 0x103   :  { %v328_v42 = vcombine.high %v320_v34, %v320_v34  ;;  %v329_v43 = vcombine.high %v327_v35, %v327_v35  ;;  %v336_v44 = vrot.slane %v320_v34, %v6726_v57  ;;  %v343_v45 = vrot.slane %v327_v35, %v6726_v57 }
 0x104   :  { %v399_v46 = vrot.slane %v377_v38, %v6726_v57  ;;  %v406_v47 = vrot.slane %v378_v39, %v6726_v57  ;;  %v407_v48 = vcombine.high %v385_v40, %v385_v40  ;;  %v408_v49 = vcombine.high %v392_v41, %v392_v41 }
 0x105   :  { %v747_v50 = vcombine.low %v6523_v55, %v385_v40  ;;  %v350_v51 = vrot.slane %v328_v42, %v6726_v57  ;;  %v357_v52 = vrot.slane %v329_v43, %v6726_v57  ;;  %v358_v53 = vcombine.high %v336_v44, %v336_v44  ;;  %v6212_v54 = vpop.f32.mrb[8].mxu0 }
 0x106   :  { %v409_v56 = vcombine.high %v399_v46, %v399_v46  ;;  %v410_v58 = vcombine.high %v406_v47, %v406_v47  ;;  %v748_v59 = vcombine.low %v399_v46, %v407_v48  ;;  %v863_v61 = vcombine.low %v406_v47, %v408_v49  ;;  %v234_v63 = vpop.f32.mrb[9].mxu0 }
 0x107   :  { %v757_v0 = vrot.slane %v747_v50, %v6726_v57  ;;  %v359_v1 = vcombine.high %v343_v45, %v343_v45  ;;  %v360_v3 = vcombine.high %v350_v51, %v350_v51  ;;  %v361_v4 = vcombine.high %v357_v52, %v357_v52  ;;  %v6213_v5 = vpop.f32.mrb[10].mxu0 }
 0x108   :  { %v6789_v6 = vrot.slane %v748_v59, %v6726_v57  ;;  %v813_v7 = vcombine.low %v409_v56, %v392_v41  ;;  %v6792_v8 = vrot.slane %v863_v61, %v6726_v57  ;;  %v913_v9 = vcombine.low %v410_v58, %v6523_v55  ;;  %v237_v10 = vpop.f32.mrb[11].mxu0 }
 0x109   :  { %v707_v11 = vcombine.low %v6523_v55, %v336_v44  ;;  %v708_v12 = vcombine.low %v350_v51, %v358_v53  ;;  %v796_v13 = vcombine.low %v360_v3, %v343_v45  ;;  %v846_v14 = vcombine.low %v357_v52, %v359_v1 }
 0x10a   :  { %v6797_v15 = vcombine.low %v757_v0, %v6789_v6  ;;  %v6800_v16 = vrot.slane %v813_v7, %v6726_v57  ;;  %v921_v17 = vrot.slane %v913_v9, %v6726_v57  ;;  %v6804_v18 = vcombine.low %v361_v4, %v6523_v55 }
 0x10b   :  { %v722_v19 = vrot.slane %v707_v11, %v6726_v57  ;;  %v6808_v20 = vrot.slane %v708_v12, %v6726_v57  ;;  %v6811_v22 = vrot.slane %v796_v13, %v6726_v57  ;;  %v6814_v24 = vrot.slane %v846_v14, %v6726_v57 }
 0x10c   :  { %v829_v25 = vcombine.low %v6789_v6, %v6800_v16  ;;  %v879_v27 = vcombine.low %v6800_v16, %v6792_v8  ;;  %v6821_v29 = vcombine.low %v6792_v8, %v921_v17  ;;  %v903_v30 = vrot.slane %v6804_v18, %v6726_v57 }
 0x10d   :  { %v6826_v33 = vcombine.low %v722_v19, %v6808_v20  ;;  %v804_v34 = vcombine.low %v6808_v20, %v6811_v22  ;;  %v854_v35 = vcombine.low %v6811_v22, %v6814_v24  ;;  %v287_v38 = vmax.f32 %v6751_v21, %v6765_v31  ;;  %v6216_v39 = vpop.f32.mrb[12].mxu0 }
 0x10e   :  { %v285_v40 = vmax.f32 %v6757_v26, %v6773_v36  ;;  %v272_v41 = vmul.f32 0.2, %v6768_v32  ;;  %v270_v42 = vmul.f32 0.2, %v6776_v37  ;;  %v243_v43 = vadd.f32 %v6212_v54, %v6737_v62  ;;  %v250_v44 = vpop.f32.mrb[13].mxu0 }
 0x10f   :  { %v235_v45 = vadd.f32 %v6737_v62, %v234_v63  ;;  %v246_v46 = vadd.f32 %v6213_v5, %v6737_v62  ;;  %v238_v47 = vadd.f32 %v6737_v62, %v237_v10  ;;  %v6843_v48 = vadd.f32 %v6216_v39, %v6737_v62  ;;  %v6217_v21 = vpop.f32.mrb[14].mxu0 }
 0x110   :  { %v288_v31 = vmax.f32 %v6768_v32, %v272_v41  ;;  %v286_v26 = vmax.f32 %v6776_v37, %v270_v42  ;;  %v275_v36 = vmul.f32 0.2, %v243_v43  ;;  %v6848_v49 = vadd.f32 %v6737_v62, %v250_v44  ;;  %v6850_v50 = vpop.f32.mrb[15].mxu0 }
 0x111   :  { %v273_v51 = vmul.f32 0.2, %v235_v45  ;;  %v276_v52 = vmul.f32 0.2, %v246_v46  ;;  %v274_v53 = vmul.f32 0.2, %v238_v47  ;;  %v6853_v54 = vadd.f32 %v6217_v21, %v6737_v62 }
 0x112   :  { %v300_v56 = vpack.c.bf16 %v288_v31, %v287_v38  ;;  %v5412_v58 = vpack.c.bf16 %v288_v31, %v288_v31  ;;  %v299_v59 = vpack.c.bf16 %v286_v26, %v285_v40  ;;  %v5411_v61 = vpack.c.bf16 %v286_v26, %v286_v26 }
 0x113   :  { %v291_v63 = vmax.f32 %v243_v43, %v275_v36  ;;  %v289_v32 = vmax.f32 %v235_v45, %v273_v51  ;;  %v6855_v0 = vmax.f32 %v246_v46, %v276_v52  ;;  %v6857_v37 = vmax.f32 %v238_v47, %v274_v53 }
 0x114   :  { %v467_v1 = vrot.slane %v300_v56, %v6726_v57  ;;  %v474_v3 = vrot.slane %v5412_v58, %v6726_v57  ;;  %v418_v4 = vrot.slane %v299_v59, %v6726_v57  ;;  %v425_v5 = vrot.slane %v5411_v61, %v6726_v57 }
 0x115   :  { %v302_v7 = vpack.c.bf16 %v6855_v0, %v291_v63  ;;  %v5414_v9 = vpack.c.bf16 %v6855_v0, %v6855_v0  ;;  %v301_v10 = vpack.c.bf16 %v6857_v37, %v289_v32  ;;  %v5413_v11 = vpack.c.bf16 %v6857_v37, %v6857_v37 }
 0x116   :  { %v475_v12 = vcombine.high %v467_v1, %v467_v1  ;;  %v476_v13 = vcombine.high %v474_v3, %v474_v3  ;;  %v483_v14 = vrot.slane %v467_v1, %v6726_v57  ;;  %v490_v17 = vrot.slane %v474_v3, %v6726_v57 }
 0x117   :  { %v426_v19 = vcombine.high %v418_v4, %v418_v4  ;;  %v427_v38 = vcombine.high %v425_v5, %v425_v5  ;;  %v434_v39 = vrot.slane %v418_v4, %v6726_v57  ;;  %v441_v40 = vrot.slane %v425_v5, %v6726_v57 }
 0x118   :  { %v497_v41 = vrot.slane %v475_v12, %v6726_v57  ;;  %v504_v42 = vrot.slane %v476_v13, %v6726_v57  ;;  %v505_v43 = vcombine.high %v483_v14, %v483_v14  ;;  %v506_v44 = vcombine.high %v490_v17, %v490_v17 }
 0x119   :  { %v946_v45 = vcombine.low %v6523_v55, %v483_v14  ;;  %v448_v46 = vrot.slane %v426_v19, %v6726_v57  ;;  %v455_v47 = vrot.slane %v427_v38, %v6726_v57  ;;  %v456_v21 = vcombine.high %v434_v39, %v434_v39 }
 0x11a   :  { %v507_v31 = vcombine.high %v497_v41, %v497_v41  ;;  %v508_v26 = vcombine.high %v504_v42, %v504_v42  ;;  %v947_v36 = vcombine.low %v497_v41, %v505_v43  ;;  %v1028_v51 = vcombine.low %v504_v42, %v506_v44 }
 0x11b   :  { %v956_v52 = vrot.slane %v946_v45, %v6726_v57  ;;  %v457_v53 = vcombine.high %v441_v40, %v441_v40  ;;  %v458_v56 = vcombine.high %v448_v46, %v448_v46  ;;  %v459_v58 = vcombine.high %v455_v47, %v455_v47 }
 0x11c   :  { %v963_v59 = vrot.slane %v947_v36, %v6726_v57  ;;  %v995_v61 = vcombine.low %v507_v31, %v490_v17  ;;  %v1036_v63 = vrot.slane %v1028_v51, %v6726_v57  ;;  %v1061_v32 = vcombine.low %v508_v26, %v6523_v55 }
 0x11d   :  { %v749_v0 = vcombine.low %v6523_v55, %v434_v39  ;;  %v750_v37 = vcombine.low %v448_v46, %v456_v21  ;;  %v814_v1 = vcombine.low %v458_v56, %v441_v40  ;;  %v864_v3 = vcombine.low %v455_v47, %v457_v53 }
 0x11e   :  { %v6883_v4 = vcombine.low %v956_v52, %v963_v59  ;;  %v1003_v5 = vrot.slane %v995_v61, %v6726_v57  ;;  %v1069_v12 = vrot.slane %v1061_v32, %v6726_v57  ;;  %v914_v13 = vcombine.low %v459_v58, %v6523_v55 }
 0x11f   :  { %v771_v14 = vrot.slane %v749_v0, %v6726_v57  ;;  %v778_v17 = vrot.slane %v750_v37, %v6726_v57  ;;  %v828_v19 = vrot.slane %v814_v1, %v6726_v57  ;;  %v878_v38 = vrot.slane %v864_v3, %v6726_v57 }
 0x120   :  { %v986_v39 = vrot.slane %v6883_v4, %v6726_v57  ;;  %v1011_v40 = vcombine.low %v963_v59, %v1003_v5  ;;  %v1044_v41 = vcombine.low %v1003_v5, %v1036_v63  ;;  %v6894_v42 = vcombine.low %v1036_v63, %v1069_v12 }
 0x121   :  { %v6896_v43 = vcombine.low %v771_v14, %v778_v17  ;;  %v830_v44 = vcombine.low %v778_v17, %v828_v19  ;;  %v880_v45 = vcombine.low %v828_v19, %v878_v38  ;;  %v928_v46 = vrot.slane %v914_v13, %v6726_v57 }
 0x122   :  { %v6900_v47 = vrot.slane %v1011_v40, %v6726_v57  ;;  %v6903_v21 = vrot.slane %v1044_v41, %v6726_v57  ;;  %v1085_v31 = vrot.slane %v6894_v42, %v6726_v57  ;;  %v565_v26 = vrot.slane %v302_v7, %v6726_v57 }
 0x123   :  { %v6911_v51 = vrot.slane %v830_v44, %v6726_v57  ;;  %v6914_v52 = vrot.slane %v880_v45, %v6726_v57  ;;  %v6916_v53 = vcombine.low %v878_v38, %v928_v46  ;;  %v572_v56 = vrot.slane %v5414_v9, %v6726_v57 }
 0x124   :  { %v573_v58 = vcombine.high %v565_v26, %v565_v26  ;;  %v581_v59 = vrot.slane %v565_v26, %v6726_v57  ;;  %v516_v61 = vrot.slane %v301_v10, %v6726_v57  ;;  %v523_v63 = vrot.slane %v5413_v11, %v6726_v57 }
 0x125   :  { %v6925_v32 = vmul.f32 0.2, %v6843_v48  ;;  %v6928_v0 = vmul.f32 0.2, %v6848_v49  ;;  %v574_v37 = vcombine.high %v572_v56, %v572_v56  ;;  %v588_v1 = vrot.slane %v572_v56, %v6726_v57 }
 0x126   :  { %v595_v9 = vrot.slane %v573_v58, %v6726_v57  ;;  %v603_v3 = vcombine.high %v581_v59, %v581_v59  ;;  %v1094_v5 = vcombine.low %v6523_v55, %v581_v59  ;;  %v524_v10 = vcombine.high %v516_v61, %v516_v61 }
 0x127   :  { %v525_v12 = vcombine.high %v523_v63, %v523_v63  ;;  %v532_v13 = vrot.slane %v516_v61, %v6726_v57  ;;  %v602_v11 = vrot.slane %v574_v37, %v6726_v57  ;;  %v604_v14 = vcombine.high %v588_v1, %v588_v1 }
 0x128   :  { %v605_v17 = vcombine.high %v595_v9, %v595_v9  ;;  %v1095_v19 = vcombine.low %v595_v9, %v603_v3  ;;  %v1104_v38 = vrot.slane %v1094_v5, %v6726_v57  ;;  %v539_v40 = vrot.slane %v523_v63, %v6726_v57 }
 0x129   :  { %v546_v41 = vrot.slane %v524_v10, %v6726_v57  ;;  %v553_v44 = vrot.slane %v525_v12, %v6726_v57  ;;  %v606_v45 = vcombine.high %v602_v11, %v602_v11  ;;  %v1176_v56 = vcombine.low %v602_v11, %v604_v14 }
 0x12a   :  { %v1111_v46 = vrot.slane %v1095_v19, %v6726_v57  ;;  %v1143_v26 = vcombine.low %v605_v17, %v588_v1  ;;  %v554_v58 = vcombine.high %v532_v13, %v532_v13  ;;  %v555_v59 = vcombine.high %v539_v40, %v539_v40 }
 0x12b   :  { %v556_v61 = vcombine.high %v546_v41, %v546_v41  ;;  %v557_v37 = vcombine.high %v553_v44, %v553_v44  ;;  %v1184_v3 = vrot.slane %v1176_v56, %v6726_v57  ;;  %v1209_v63 = vcombine.low %v606_v45, %v6523_v55 }
 0x12c   :  { %v1126_v7 = vcombine.low %v1104_v38, %v1111_v46  ;;  %v1151_v9 = vrot.slane %v1143_v26, %v6726_v57  ;;  %v948_v5 = vcombine.low %v6523_v55, %v532_v13  ;;  %v949_v10 = vcombine.low %v546_v41, %v554_v58 }
 0x12d   :  { %v996_v12 = vcombine.low %v556_v61, %v539_v40  ;;  %v1029_v36 = vcombine.low %v553_v44, %v555_v59  ;;  %v1217_v14 = vrot.slane %v1209_v63, %v6726_v57  ;;  %v295_v58 = vmax.f32 %v6843_v48, %v6925_v32 }
 0x12e   :  { %v1134_v19 = vrot.slane %v1126_v7, %v6726_v57  ;;  %v1159_v1 = vcombine.low %v1111_v46, %v1151_v9  ;;  %v1192_v11 = vcombine.low %v1151_v9, %v1184_v3  ;;  %v970_v17 = vrot.slane %v948_v5, %v6726_v57 }
 0x12f   :  { %v977_v38 = vrot.slane %v949_v10, %v6726_v57  ;;  %v1010_v26 = vrot.slane %v996_v12, %v6726_v57  ;;  %v1043_v56 = vrot.slane %v1029_v36, %v6726_v57  ;;  %v6954_v40 = vcombine.low %v1184_v3, %v1217_v14 }
 0x130   :  { %v1167_v45 = vrot.slane %v1159_v1, %v6726_v57  ;;  %v6952_v13 = vrot.slane %v1192_v11, %v6726_v57  ;;  %v1062_v7 = vcombine.low %v557_v37, %v6523_v55  ;;  %v293_v61 = vmax.f32 %v6848_v49, %v6928_v0 }
 0x131   :  { %v6957_v41 = vcombine.low %v970_v17, %v977_v38  ;;  %v1012_v44 = vcombine.low %v977_v38, %v1010_v26  ;;  %v1045_v46 = vcombine.low %v1010_v26, %v1043_v56  ;;  %v1233_v59 = vrot.slane %v6954_v40, %v6726_v57 }
 0x132   :  { %v1076_v36 = vrot.slane %v1062_v7, %v6726_v57  ;;  %v280_v9 = vmul.f32 0.2, %v6853_v54  ;;  %v254_v48 = vadd.f32 %v6737_v62, %v6850_v50  ;;  %v787_v49 = vrot.slane %v6797_v15, %v6726_v57 }
 0x133   :  { %v993_v37 = vrot.slane %v6957_v41, %v6726_v57  ;;  %v6970_v3 = vrot.slane %v1012_v44, %v6726_v57  ;;  %v6973_v63 = vrot.slane %v1045_v46, %v6726_v57  ;;  %v837_v0 = vrot.slane %v829_v25, %v6726_v57 }
 0x134   :  { %v6977_v32 = vcombine.low %v1043_v56, %v1076_v36  ;;  %v296_v5 = vmax.f32 %v6853_v54, %v280_v9  ;;  %v278_v10 = vmul.f32 0.2, %v254_v48  ;;  %v887_v12 = vrot.slane %v879_v27, %v6726_v57 }
 0x135   :  { %v937_v62 = vrot.slane %v6821_v29, %v6726_v57  ;;  %v5426_v50 = vcombine.low %v986_v39, %v6900_v47  ;;  %v5422_v25 = vcombine.low %v787_v49, %v837_v0  ;;  %v5428_v8 = vcombine.low %v6903_v21, %v1085_v31 }
 0x136   :  { %v1092_v15 = vrot.slane %v6977_v32, %v6726_v57  ;;  %v304_v54 = vpack.c.bf16 %v296_v5, %v295_v58  ;;  %v5416_v6 = vpack.c.bf16 %v296_v5, %v296_v5  ;;  %v294_v1 = vmax.f32 %v254_v48, %v278_v10 }
 0x137   :  { %v5424_v11 = vcombine.low %v887_v12, %v937_v62  ;;  %v7003_v16 = vrot.slane %v5426_v50, %v6726_v57  ;;  %v1623_v4 = vrot.slane %v5422_v25, %v6726_v57  ;;  %v7008_v39 = vcombine.low %v1134_v19, %v1167_v45 }
 0x138   :  { %v663_v27 = vrot.slane %v304_v54, %v6726_v57  ;;  %v670_v29 = vrot.slane %v5416_v6, %v6726_v57  ;;  %v303_v47 = vpack.c.bf16 %v294_v1, %v293_v61  ;;  %v5415_v14 = vpack.c.bf16 %v294_v1, %v294_v1 }
 0x139   :  { %v1637_v17 = vrot.slane %v5424_v11, %v6726_v57  ;;  %v7012_v38 = vrot.slane %v5428_v8, %v6726_v57  ;;  %v745_v40 = vrot.slane %v6826_v33, %v6726_v57  ;;  %v6293_v33 = vld [vmem:[%s8245_s3 + $0x1d0] sm:$0xff]   ;;  %v904_v22 = vcombine.low %v6814_v24, %v903_v30 }
 0x13a   :  { %v671_v42 = vcombine.high %v663_v27, %v663_v27  ;;  %v672_v21 = vcombine.high %v670_v29, %v670_v29  ;;  %v679_v31 = vrot.slane %v663_v27, %v6726_v57  ;;  %v686_v26 = vrot.slane %v670_v29, %v6726_v57 }
 0x13b   :  { %v614_v56 = vrot.slane %v303_v47, %v6726_v57  ;;  %v621_v7 = vrot.slane %v5415_v14, %v6726_v57  ;;  %v1650_v44 = vcombine.high %v1623_v4, %v1637_v17  ;;  %v1649_v19 = vcombine.low %v1623_v4, %v1637_v17 }
 0x13c   :  { %v693_v45 = vrot.slane %v671_v42, %v6726_v57  ;;  %v700_v46 = vrot.slane %v672_v21, %v6726_v57  ;;  %v701_v58 = vcombine.high %v679_v31, %v679_v31  ;;  %v702_v36 = vcombine.high %v686_v26, %v686_v26 }
 0x13d   :  { %v1242_v61 = vcombine.low %v6523_v55, %v679_v31  ;;  %v622_v9 = vcombine.high %v614_v56, %v614_v56  ;;  %v623_v48 = vcombine.high %v621_v7, %v621_v7  ;;  %v630_v5 = vrot.slane %v614_v56, %v6726_v57 }
 0x13e   :  { %v703_v49 = vcombine.high %v693_v45, %v693_v45  ;;  %v704_v0 = vcombine.high %v700_v46, %v700_v46  ;;  %v1243_v10 = vcombine.low %v693_v45, %v701_v58  ;;  %v1284_v12 = vcombine.low %v700_v46, %v702_v36 }
 0x13f   :  { %v1250_v62 = vrot.slane %v1242_v61, %v6726_v57  ;;  %v637_v50 = vrot.slane %v621_v7, %v6726_v57  ;;  %v644_v54 = vrot.slane %v622_v9, %v6726_v57  ;;  %v651_v6 = vrot.slane %v623_v48, %v6726_v57 }
 0x140   :  { %v7027_v25 = vrot.slane %v1243_v10, %v6726_v57  ;;  %v1267_v1 = vcombine.low %v703_v49, %v686_v26  ;;  %v7030_v11 = vrot.slane %v1284_v12, %v6726_v57  ;;  %v7033_v8 = vcombine.low %v704_v0, %v6523_v55 }
 0x141   :  { %v652_v27 = vcombine.high %v630_v5, %v630_v5  ;;  %v653_v29 = vcombine.high %v637_v50, %v637_v50  ;;  %v654_v4 = vcombine.high %v644_v54, %v644_v54  ;;  %v655_v47 = vcombine.high %v651_v6, %v651_v6 }
 0x142   :  { %v7036_v14 = vcombine.low %v1250_v62, %v7027_v25  ;;  %v7039_v17 = vrot.slane %v1267_v1, %v6726_v57  ;;  %v1308_v42 = vrot.slane %v7033_v8, %v6726_v57  ;;  %v1096_v21 = vcombine.low %v6523_v55, %v630_v5  ;;  %v6287_v1 = vld [vmem:[%s8245_s3 + $0x180] sm:$0xff]  }
 0x143   :  { %v1097_v31 = vcombine.low %v644_v54, %v652_v27  ;;  %v1144_v26 = vcombine.low %v654_v4, %v637_v50  ;;  %v1177_v56 = vcombine.low %v651_v6, %v653_v29  ;;  %v1210_v7 = vcombine.low %v655_v47, %v6523_v55  ;;  %v6286_v6 = vld [vmem:[%s8245_s3 + $0x100] sm:$0xff]   ;;  %v6288_v29 = vld [vmem:[%s8245_s3 + $0x148] sm:$0xff]  }
 0x144   :  { %v1275_v45 = vcombine.low %v7027_v25, %v7039_v17  ;;  %v1292_v46 = vcombine.low %v7039_v17, %v7030_v11  ;;  %v1118_v58 = vrot.slane %v1096_v21, %v6726_v57  ;;  %v7051_v36 = vrot.slane %v1650_v44, %v6726_v57  ;;  %v6289_v4 = vld [vmem:[%s8245_s3 + $0x1c8] sm:$0xff]   ;;  %v6310_v17 = vld [vmem:[%s8245_s3 + $0x130] sm:$0xff]  }
 0x145   :  { %v1125_v61 = vrot.slane %v1097_v31, %v6726_v57  ;;  %v1158_v9 = vrot.slane %v1144_v26, %v6726_v57  ;;  %v1191_v48 = vrot.slane %v1177_v56, %v6726_v57  ;;  %v1224_v5 = vrot.slane %v1210_v7, %v6726_v57 }
 0x146   :  { %v1713_v49 = vcombine.low %v6754_v23, %v7051_v36  ;;  %v1714_v0 = vcombine.high %v6754_v23, %v7051_v36  ;;  %v7062_v10 = vrot.slane %v1649_v19, %v6726_v57  ;;  %v1750_v44 = vcombine.high %v7003_v16, %v7012_v38 }
 0x147   :  { %v7066_v12 = vcombine.low %v1118_v58, %v1125_v61  ;;  %v1160_v62 = vcombine.low %v1125_v61, %v1158_v9  ;;  %v1193_v50 = vcombine.low %v1158_v9, %v1191_v48  ;;  %v7068_v54 = vcombine.low %v1191_v48, %v1224_v5  ;;  %v6290_v9 = vld [vmem:[%s8245_s3 + $0x108] sm:$0xff]  }
 0x148   :  { %2765 = vmatprep.mubr.bf16.mxu1 %v1713_v49  ;;  %2814 = vmatprep.mubr.bf16.mxu0 %v1714_v0  ;;  %v1709_v19 = vcombine.low %v6760_v28, %v7062_v10  ;;  %v1710_v27 = vcombine.high %v6760_v28, %v7062_v10  ;;  %v7087_v47 = vrot.slane %v1750_v44, %v6726_v57  ;;  %v6291_v48 = vld [vmem:[%s8245_s3 + $0x188] sm:$0xff]  }
 0x149   :  { %v1141_v21 = vrot.slane %v7066_v12, %v6726_v57  ;;  %v7092_v31 = vrot.slane %v1160_v62, %v6726_v57  ;;  %v7095_v26 = vrot.slane %v1193_v50, %v6726_v57  ;;  %v1240_v56 = vrot.slane %v7068_v54, %v6726_v57  ;;  %v6302_v54 = vld [vmem:[%s8245_s3 + $0x120] sm:$0xff]  }
 0x14a   :  { %2766 = vmatmul.mubr.bf16.vlgmr.msra.gmra.mrb[0].mxu1 %v1709_v19  ;;  %2815 = vmatmul.mubr.bf16.vlgmr.msra.gmra.mrb[16].mxu0 %v1710_v27  ;;  %v5432_v7 = vcombine.low %v6952_v13, %v1233_v59  ;;  %v1799_v58 = vrot.slane %v7008_v39, %v6726_v57  ;;  %v1749_v61 = vcombine.low %v7003_v16, %v7012_v38  ;;  %v6292_v16 = vld [vmem:[%s8245_s3 + $0x150] sm:$0xff]  }
 0x14b   :  { %5795 = vmatpush3.bf16.msra.mxu1 %v6286_v6  ;;  %5823 = vmatpush3.bf16.msra.mxu0 %v6287_v1  ;;  %v811_v13 = vrot.slane %v804_v34, %v6726_v57  ;;  %v861_v59 = vrot.slane %v854_v35, %v6726_v57  ;;  %v8253_v35 = vrot.slane %v6896_v43, %v6726_v57  ;;  %v6294_v43 = vld [vmem:[%s8245_s3 + $0x110] sm:$0xff]  }
 0x14c   :  { %5796 = vmatprep.subr.bf16.mxu1 %v6288_v29  ;;  %5824 = vmatprep.subr.bf16.mxu0 %v6289_v4  ;;  %v1813_v39 = vrot.slane %v5432_v7, %v6726_v57  ;;  %v7131_v20 = vrot.slane %v1749_v61, %v6726_v57  ;;  %v8254_v5 = vrot.slane %v6916_v53, %v6726_v57  ;;  %v6298_v7 = vld [vmem:[%s8245_s3 + $0x118] sm:$0xff]  }
 0x14d   :  { %v5419_v34 = vcombine.low %v745_v40, %v811_v13  ;;  %v5423_v38 = vcombine.low %v8253_v35, %v6911_v51  ;;  %v5427_v0 = vcombine.low %v993_v37, %v6970_v3  ;;  %v911_v24 = vrot.slane %v904_v22, %v6726_v57  ;;  %v6295_v51 = vld [vmem:[%s8245_s3 + $0x190] sm:$0xff]   ;;  %v6296_v37 = vld [vmem:[%s8245_s3 + $0x158] sm:$0xff]   ;;  %v6300_v40 = vld [vmem:[%s8245_s3 + $0x160] sm:$0xff]  }
 0x14e   :  { %v5425_v49 = vcombine.low %v6914_v52, %v8254_v5  ;;  %v1822_v44 = vcombine.high %v1799_v58, %v1813_v39  ;;  %v1821_v18 = vcombine.low %v1799_v58, %v1813_v39  ;;  %v5429_v30 = vcombine.low %v6973_v63, %v1092_v15  ;;  %v6297_v3 = vld [vmem:[%s8245_s3 + $0x1d8] sm:$0xff]   ;;  %v6301_v13 = vld [vmem:[%s8245_s3 + $0x1e0] sm:$0xff]  }
 0x14f   :  { %5797 = vmatpush3.bf16.msra.mxu1 %v6290_v9  ;;  %5825 = vmatpush3.bf16.msra.mxu0 %v6291_v48  ;;  %v1602_v52 = vrot.slane %v5419_v34, %v6726_v57  ;;  %v1630_v53 = vrot.slane %v5423_v38, %v6726_v57  ;;  %v5421_v15 = vcombine.low %v861_v59, %v911_v24  ;;  %v6299_v58 = vld [vmem:[%s8245_s3 + $0x198] sm:$0xff]   ;;  %v6304_v24 = vld [vmem:[%s8245_s3 + $0x168] sm:$0xff]  }
 0x150   :  { %v1644_v41 = vrot.slane %v5425_v49, %v6726_v57  ;;  %5798 = vmatprep.subr.bf16.mxu1 %v6292_v16  ;;  %5826 = vmatprep.subr.bf16.mxu0 %v6293_v33  ;;  %v7170_v63 = vrot.slane %v1822_v44, %v6726_v57  ;;  %v7173_v32 = vrot.slane %v1821_v18, %v6726_v57 }
 0x151   :  { %v1734_v6 = vrot.slane %v5427_v0, %v6726_v57  ;;  %v1748_v1 = vrot.slane %v5429_v30, %v6726_v57  ;;  %v1616_v61 = vrot.slane %v5421_v15, %v6726_v57  ;;  %v5431_v16 = vcombine.low %v1141_v21, %v7092_v31  ;;  %v6303_v21 = vld [vmem:[%s8245_s3 + $0x1a0] sm:$0xff]   ;;  %v6305_v30 = vld [vmem:[%s8245_s3 + $0x1e8] sm:$0xff]  }
 0x152   :  { %v1651_v62 = vcombine.low %v1630_v53, %v1644_v41  ;;  %v1652_v50 = vcombine.high %v1630_v53, %v1644_v41  ;;  %v1857_v19 = vcombine.low %v7087_v47, %v7170_v63  ;;  %v1858_v27 = vcombine.high %v7087_v47, %v7170_v63  ;;  %v6307_v15 = vld [vmem:[%s8245_s3 + $0x1a8] sm:$0xff]  }
 0x153   :  { %v1853_v29 = vcombine.low %v7131_v20, %v7173_v32  ;;  %v1854_v4 = vcombine.high %v7131_v20, %v7173_v32  ;;  %5799 = vmatpush3.bf16.msra.mxu1 %v6294_v43  ;;  %5827 = vmatpush3.bf16.msra.mxu0 %v6295_v51  ;;  %v1752_v59 = vcombine.high %v1734_v6, %v1748_v1 }
 0x154   :  { %v7193_v9 = vrot.slane %v1652_v50, %v6726_v57  ;;  %v7196_v48 = vrot.slane %v1651_v62, %v6726_v57  ;;  %5800 = vmatprep.subr.bf16.mxu1 %v6296_v37  ;;  %5828 = vmatprep.subr.bf16.mxu0 %v6297_v3  ;;  %v5433_v33 = vcombine.low %v7095_v26, %v1240_v56  ;;  %v6306_v3 = vld [vmem:[%s8245_s3 + $0x128] sm:$0xff]  }
 0x155   :  { %2773 = vmatprep.mubr.bf16.mxu1 %v1857_v19  ;;  %2822 = vmatprep.mubr.bf16.mxu0 %v1858_v27  ;;  %v1647_v39 = vcombine.low %v1602_v52, %v1616_v61  ;;  %v1648_v22 = vcombine.high %v1602_v52, %v1616_v61  ;;  %v1751_v34 = vcombine.low %v1734_v6, %v1748_v1  ;;  %v6308_v1 = vld [vmem:[%s8245_s3 + $0x170] sm:$0xff]  }
 0x156   :  { %2774 = vmatmul.mubr.bf16.gmra.mrb[4].mxu1 %v1853_v29  ;;  %2823 = vmatmul.mubr.bf16.gmra.mrb[20].mxu0 %v1854_v4  ;;  %v7213_v35 = vrot.slane %v1752_v59, %v6726_v57  ;;  %v1806_v38 = vrot.slane %v5431_v16, %v6726_v57  ;;  %v1820_v12 = vrot.slane %v5433_v33, %v6726_v57  ;;  %v6309_v19 = vld [vmem:[%s8245_s3 + $0x1f0] sm:$0xff]  }
 0x157   :  { %5801 = vmatpush3.bf16.msra.mxu1 %v6298_v7  ;;  %5829 = vmatpush3.bf16.msra.mxu0 %v6299_v58  ;;  %v1680_v31 = vrot.slane %v1648_v22, %v6726_v57  ;;  %v7225_v26 = vrot.slane %v1647_v39, %v6726_v57  ;;  %v7228_v56 = vrot.slane %v1751_v34, %v6726_v57  ;;  %v6314_v22 = vld [vmem:[%s8245_s3 + $0x138] sm:$0xff]  }
 0x158   :  { %5802 = vmatprep.subr.bf16.mxu1 %v6300_v40  ;;  %5830 = vmatprep.subr.bf16.mxu0 %v6301_v13  ;;  %v1824_v5 = vcombine.high %v1806_v38, %v1820_v12  ;;  %v1823_v49 = vcombine.low %v1806_v38, %v1820_v12  ;;  %v1785_v0 = vcombine.low %v7051_v36, %v7087_v47  ;;  %v6313_v13 = vld [vmem:[%s8245_s3 + $0x1f8] sm:$0xff]   ;;  %v6316_v12 = vld [vmem:[%s8245_s3 + $0x240] sm:$0xff]  }
 0x159   :  { %v1715_v44 = vcombine.low %v1680_v31, %v7193_v9  ;;  %v1716_v18 = vcombine.high %v1680_v31, %v7193_v9  ;;  %v1711_v43 = vcombine.low %v7225_v26, %v7196_v48  ;;  %v1712_v51 = vcombine.high %v7225_v26, %v7196_v48  ;;  %v6315_v34 = vld [vmem:[%s8245_s3 + $0x1b8] sm:$0xff]   ;;  %v6325_v26 = vld [vmem:[%s8245_s3 + $0x2d0] sm:$0xff]  }
 0x15a   :  { %v7245_v52 = vrot.slane %v1824_v5, %v6726_v57  ;;  %v7248_v53 = vrot.slane %v1823_v49, %v6726_v57  ;;  %v1786_v41 = vcombine.high %v7051_v36, %v7087_v47  ;;  %v1781_v37 = vcombine.low %v7062_v10, %v7131_v20  ;;  %v6333_v36 = vld [vmem:[%s8245_s3 + $0x2e0] sm:$0xff]  }
 0x15b   :  { %5803 = vmatpush3.bf16.msra.mxu1 %v6302_v54  ;;  %5831 = vmatpush3.bf16.msra.mxu0 %v6303_v21  ;;  %v1782_v62 = vcombine.high %v7062_v10, %v7131_v20  ;;  %v1265_v50 = vrot.slane %v7036_v14, %v6726_v57  ;;  %v1282_v6 = vrot.slane %v1275_v45, %v6726_v57  ;;  %v6317_v54 = vld [vmem:[%s8245_s3 + $0x2c0] sm:$0xff]   ;;  %v6356_v10 = vld [vmem:[%s8245_s3 + $0x350] sm:$0xff]  }
 0x15c   :  { %2863 = vmatprep.mubr.bf16.mxu1 %v1715_v44  ;;  %2912 = vmatprep.mubr.bf16.mxu0 %v1716_v18  ;;  %v1859_v27 = vcombine.low %v7213_v35, %v7245_v52  ;;  %v1860_v14 = vcombine.high %v7213_v35, %v7245_v52  ;;  %v1855_v25 = vcombine.low %v7228_v56, %v7248_v53  ;;  %v6318_v44 = vld [vmem:[%s8245_s3 + $0x200] sm:$0xff]   ;;  %v6357_v20 = vld [vmem:[%s8245_s3 + $0x3d0] sm:$0xff]  }
 0x15d   :  { %5804 = vmatprep.subr.bf16.mxu1 %v6304_v24  ;;  %5832 = vmatprep.subr.bf16.mxu0 %v6305_v30  ;;  %v1856_v45 = vcombine.high %v7228_v56, %v7248_v53  ;;  %v1299_v29 = vrot.slane %v1292_v46, %v6726_v57  ;;  %v1309_v4 = vcombine.low %v7030_v11, %v1308_v42  ;;  %v6311_v11 = vld [vmem:[%s8245_s3 + $0x1b0] sm:$0xff]   ;;  %v6312_v46 = vld [vmem:[%s8245_s3 + $0x178] sm:$0xff]   ;;  %v6319_v18 = vld [vmem:[%s8245_s3 + $0x280] sm:$0xff]  }
 0x15e   :  { %v5434_v7 = vcombine.low %v1265_v50, %v1282_v6  ;;  %v1787_v58 = vcombine.low %v7193_v9, %v7213_v35  ;;  %v1788_v61 = vcombine.high %v7193_v9, %v7213_v35  ;;  %v1783_v40 = vcombine.low %v7196_v48, %v7228_v56  ;;  %v6320_v24 = vld [vmem:[%s8245_s3 + $0x248] sm:$0xff]   ;;  %v6334_v47 = vld [vmem:[%s8245_s3 + $0x220] sm:$0xff]  }
 0x15f   :  { %5805 = vmatpush3.bf16.msra.mxu1 %v6306_v3  ;;  %5833 = vmatpush3.bf16.msra.mxu0 %v6307_v15  ;;  %v1316_v8 = vrot.slane %v1309_v4, %v6726_v57  ;;  %v1784_v42 = vcombine.high %v7196_v48, %v7228_v56  ;;  %v1927_v59 = vcombine.low %v7248_v53, %v6760_v28  ;;  %v6321_v30 = vld [vmem:[%s8245_s3 + $0x2c8] sm:$0xff]   ;;  %v6330_v4 = vld [vmem:[%s8245_s3 + $0x218] sm:$0xff]   ;;  %v6365_v9 = vld [vmem:[%s8245_s3 + $0x3e0] sm:$0xff]  }
 0x160   :  { %5806 = vmatprep.subr.bf16.mxu1 %v6308_v1  ;;  %5834 = vmatprep.subr.bf16.mxu0 %v6309_v19  ;;  %v1871_v33 = vrot.slane %v5434_v7, %v6726_v57  ;;  %v1928_v39 = vcombine.high %v7248_v53, %v6760_v28  ;;  %v6322_v1 = vld [vmem:[%s8245_s3 + $0x208] sm:$0xff]   ;;  %v6366_v35 = vld [vmem:[%s8245_s3 + $0x320] sm:$0xff]  }
 0x161   :  { %v5436_v16 = vcombine.low %v1299_v29, %v1316_v8  ;;  %v6323_v19 = vld [vmem:[%s8245_s3 + $0x288] sm:$0xff]   ;;  %v6329_v29 = vld [vmem:[%s8245_s3 + $0x2d8] sm:$0xff]   ;;  %v6340_v8 = vld [vmem:[%s8245_s3 + $0x270] sm:$0xff]  }
 0x162   :  { %v6337_v7 = vld [vmem:[%s8245_s3 + $0x2e8] sm:$0xff]  }
 0x163   :  { %5807 = vmatpush3.bf16.msra.mxu1 %v6310_v17  ;;  %5835 = vmatpush3.bf16.msra.mxu0 %v6311_v11  ;;  %v1885_v38 = vrot.slane %v5436_v16, %v6726_v57  ;;  %v6338_v17 = vld [vmem:[%s8245_s3 + $0x228] sm:$0xff]   ;;  %v6343_v16 = vld [vmem:[%s8245_s3 + $0x2b0] sm:$0xff]  }
 0x164   :  { %5808 = vmatprep.subr.bf16.mxu1 %v6312_v46  ;;  %5836 = vmatprep.subr.bf16.mxu0 %v6313_v13  ;;  %v6339_v11 = vld [vmem:[%s8245_s3 + $0x2a8] sm:$0xff]   ;;  %v6341_v46 = vld [vmem:[%s8245_s3 + $0x2f0] sm:$0xff]  }
 0x165   :  { %v1894_v21 = vcombine.high %v1871_v33, %v1885_v38  ;;  %v1893_v31 = vcombine.low %v1871_v33, %v1885_v38  ;;  %v6342_v13 = vld [vmem:[%s8245_s3 + $0x230] sm:$0xff]   ;;  %v6344_v33 = vld [vmem:[%s8245_s3 + $0x278] sm:$0xff]  }
 0x166   :  { %v6347_v38 = vld [vmem:[%s8245_s3 + $0x2b8] sm:$0xff]  }
 0x167   :  { %5809 = vmatpush3.bf16.msra.mxu1 %v6314_v22  ;;  %5837 = vmatpush3.bf16.msra.mxu0 %v6315_v34  ;;  %v7330_v5 = vrot.slane %v1894_v21, %v6726_v57  ;;  %v7333_v49 = vrot.slane %v1893_v31, %v6726_v57  ;;  %v6345_v22 = vld [vmem:[%s8245_s3 + $0x2f8] sm:$0xff]   ;;  %v6350_v21 = vld [vmem:[%s8245_s3 + $0x300] sm:$0xff]  }
 0x168   :  { %5850 = vmatprep.subr.bf16.mxu1 %v6316_v12  ;;  %5878 = vmatprep.subr.bf16.mxu0 %v6317_v54  ;;  %v6346_v34 = vld [vmem:[%s8245_s3 + $0x238] sm:$0xff]   ;;  %v6348_v12 = vld [vmem:[%s8245_s3 + $0x340] sm:$0xff]  }
 0x169   :  { %v1929_v3 = vcombine.low %v7170_v63, %v7330_v5  ;;  %v1930_v15 = vcombine.high %v7170_v63, %v7330_v5  ;;  %v1925_v50 = vcombine.low %v7173_v32, %v7333_v49  ;;  %v1926_v6 = vcombine.high %v7173_v32, %v7333_v49  ;;  %v6349_v54 = vld [vmem:[%s8245_s3 + $0x3c0] sm:$0xff]   ;;  %v6358_v63 = vld [vmem:[%s8245_s3 + $0x310] sm:$0xff]   ;;  %v6360_v5 = vld [vmem:[%s8245_s3 + $0x358] sm:$0xff]  }
 0x16a   :  { %2864 = vmatmul.mubr.bf16.vlgmr.msra.gmra.mrb[8].mxu1 %v1711_v43  ;;  %2913 = vmatmul.mubr.bf16.vlgmr.msra.gmra.mrb[24].mxu0 %v1712_v51  ;;  %v6324_v43 = vld [vmem:[%s8245_s3 + $0x250] sm:$0xff]   ;;  %v6351_v31 = vld [vmem:[%s8245_s3 + $0x380] sm:$0xff]   ;;  %v6369_v49 = vld [vmem:[%s8245_s3 + $0x3e8] sm:$0xff]  }
 0x16b   :  { %2871 = vmatprep.mubr.bf16.mxu1 %v1859_v27  ;;  %2920 = vmatprep.mubr.bf16.mxu0 %v1860_v14  ;;  %v6326_v51 = vld [vmem:[%s8245_s3 + $0x210] sm:$0xff]   ;;  %v6328_v14 = vld [vmem:[%s8245_s3 + $0x258] sm:$0xff]   ;;  %v6364_v32 = vld [vmem:[%s8245_s3 + $0x360] sm:$0xff]  }
 0x16c   :  { %5851 = vmatpush3.bf16.msra.mxu1 %v6318_v44  ;;  %5879 = vmatpush3.bf16.msra.mxu0 %v6319_v18  ;;  %v6327_v27 = vld [vmem:[%s8245_s3 + $0x290] sm:$0xff]   ;;  %v6352_v44 = vld [vmem:[%s8245_s3 + $0x348] sm:$0xff]  }
 0x16d   :  { %5852 = vmatprep.subr.bf16.mxu1 %v6320_v24  ;;  %5880 = vmatprep.subr.bf16.mxu0 %v6321_v30  ;;  %v6353_v18 = vld [vmem:[%s8245_s3 + $0x3c8] sm:$0xff]   ;;  %v6361_v30 = vld [vmem:[%s8245_s3 + $0x3d8] sm:$0xff]  }
 0x16e   :  { %v6354_v24 = vld [vmem:[%s8245_s3 + $0x308] sm:$0xff]  }
 0x170   :  { %5853 = vmatpush3.bf16.msra.mxu1 %v6322_v1  ;;  %5881 = vmatpush3.bf16.msra.mxu0 %v6323_v19  ;;  %v6372_v1 = vld [vmem:[%s8245_s3 + $0x370] sm:$0xff]  }
 0x171   :  { %5854 = vmatprep.subr.bf16.mxu1 %v6324_v43  ;;  %5882 = vmatprep.subr.bf16.mxu0 %v6325_v26  ;;  %v6373_v19 = vld [vmem:[%s8245_s3 + $0x3f0] sm:$0xff]  }
 0x172   :  { %2872 = vmatmul.mubr.bf16.gmra.mrb[12].mxu1 %v1855_v25  ;;  %2921 = vmatmul.mubr.bf16.gmra.mrb[28].mxu0 %v1856_v45  ;;  %v6331_v25 = vld [vmem:[%s8245_s3 + $0x298] sm:$0xff]   ;;  %v6336_v45 = vld [vmem:[%s8245_s3 + $0x268] sm:$0xff]   ;;  %v6374_v43 = vld [vmem:[%s8245_s3 + $0x330] sm:$0xff]  }
 0x173   :  { %2961 = vmatprep.mubr.bf16.mxu1 %v1785_v0  ;;  %3010 = vmatprep.mubr.bf16.mxu0 %v1786_v41  ;;  %v6332_v0 = vld [vmem:[%s8245_s3 + $0x260] sm:$0xff]   ;;  %v6375_v26 = vld [vmem:[%s8245_s3 + $0x3b0] sm:$0xff]  }
 0x174   :  { %5855 = vmatpush3.bf16.msra.mxu1 %v6326_v51  ;;  %5883 = vmatpush3.bf16.msra.mxu0 %v6327_v27  ;;  %v6335_v41 = vld [vmem:[%s8245_s3 + $0x2a0] sm:$0xff]   ;;  %v6376_v51 = vld [vmem:[%s8245_s3 + $0x378] sm:$0xff]  }
 0x175   :  { %5856 = vmatprep.subr.bf16.mxu1 %v6328_v14  ;;  %5884 = vmatprep.subr.bf16.mxu0 %v6329_v29  ;;  %v6377_v27 = vld [vmem:[%s8245_s3 + $0x3f8] sm:$0xff]  }
 0x176   :  { %v6378_v14 = vld [vmem:[%s8245_s3 + $0x338] sm:$0xff]  }
 0x177   :  { %v6379_v29 = vld [vmem:[%s8245_s3 + $0x3b8] sm:$0xff]  }
 0x178   :  { %5857 = vmatpush3.bf16.msra.mxu1 %v6330_v4  ;;  %5885 = vmatpush3.bf16.msra.mxu0 %v6331_v25  ;;  %v1931_v4 = vcombine.low %v7245_v52, %v6754_v23  ;;  %v1932_v25 = vcombine.high %v7245_v52, %v6754_v23 }
 0x179   :  { %5858 = vmatprep.subr.bf16.mxu1 %v6332_v0  ;;  %5886 = vmatprep.subr.bf16.mxu0 %v6333_v36 }
 0x17c   :  { %5859 = vmatpush3.bf16.msra.mxu1 %v6334_v47  ;;  %5887 = vmatpush3.bf16.msra.mxu0 %v6335_v41 }
 0x17d   :  { %5860 = vmatprep.subr.bf16.mxu1 %v6336_v45  ;;  %5888 = vmatprep.subr.bf16.mxu0 %v6337_v7 }
 0x180   :  { %5861 = vmatpush3.bf16.msra.mxu1 %v6338_v17  ;;  %5889 = vmatpush3.bf16.msra.mxu0 %v6339_v11 }
 0x181   :  { %5862 = vmatprep.subr.bf16.mxu1 %v6340_v8  ;;  %5890 = vmatprep.subr.bf16.mxu0 %v6341_v46 }
 0x184   :  { %5863 = vmatpush3.bf16.msra.mxu1 %v6342_v13  ;;  %5891 = vmatpush3.bf16.msra.mxu0 %v6343_v16 }
 0x185   :  { %5864 = vmatprep.subr.bf16.mxu1 %v6344_v33  ;;  %5892 = vmatprep.subr.bf16.mxu0 %v6345_v22 }
 0x188   :  { %5865 = vmatpush3.bf16.msra.mxu1 %v6346_v34  ;;  %5893 = vmatpush3.bf16.msra.mxu0 %v6347_v38 }
 0x189   :  { %5906 = vmatprep.subr.bf16.mxu1 %v6348_v12  ;;  %5934 = vmatprep.subr.bf16.mxu0 %v6349_v54 }
 0x18b   :  { %2962 = vmatmul.mubr.bf16.vlgmr.msra.gmra.mrb[16].mxu1 %v1781_v37  ;;  %3011 = vmatmul.mubr.bf16.vlgmr.msra.gmra.mrb[32].mxu0 %v1782_v62  ;;  %v6355_v37 = vld [vmem:[%s8245_s3 + $0x388] sm:$0xff]   ;;  %v6359_v62 = vld [vmem:[%s8245_s3 + $0x390] sm:$0xff]  }
 0x18c   :  { %2969 = vmatprep.mubr.bf16.mxu1 %v1929_v3  ;;  %3018 = vmatprep.mubr.bf16.mxu0 %v1930_v15  ;;  %v6362_v3 = vld [vmem:[%s8245_s3 + $0x318] sm:$0xff]  }
 0x18d   :  { %5907 = vmatpush3.bf16.msra.mxu1 %v6350_v21  ;;  %5935 = vmatpush3.bf16.msra.mxu0 %v6351_v31  ;;  %v6363_v15 = vld [vmem:[%s8245_s3 + $0x398] sm:$0xff]  }
 0x18e   :  { %5908 = vmatprep.subr.bf16.mxu1 %v6352_v44  ;;  %5936 = vmatprep.subr.bf16.mxu0 %v6353_v18 }
 0x191   :  { %5909 = vmatpush3.bf16.msra.mxu1 %v6354_v24  ;;  %5937 = vmatpush3.bf16.msra.mxu0 %v6355_v37 }
 0x192   :  { %5910 = vmatprep.subr.bf16.mxu1 %v6356_v10  ;;  %5938 = vmatprep.subr.bf16.mxu0 %v6357_v20 }
 0x193   :  { %2970 = vmatmul.mubr.bf16.gmra.mrb[20].mxu1 %v1925_v50  ;;  %3019 = vmatmul.mubr.bf16.gmra.mrb[36].mxu0 %v1926_v6  ;;  %v6370_v50 = vld [vmem:[%s8245_s3 + $0x328] sm:$0xff]  }
 0x194   :  { %3059 = vmatprep.mubr.bf16.mxu1 %v1787_v58  ;;  %3108 = vmatprep.mubr.bf16.mxu0 %v1788_v61  ;;  %v6367_v58 = vld [vmem:[%s8245_s3 + $0x3a0] sm:$0xff]   ;;  %v6368_v61 = vld [vmem:[%s8245_s3 + $0x368] sm:$0xff]  }
 0x195   :  { %5911 = vmatpush3.bf16.msra.mxu1 %v6358_v63  ;;  %5939 = vmatpush3.bf16.msra.mxu0 %v6359_v62  ;;  %v6371_v6 = vld [vmem:[%s8245_s3 + $0x3a8] sm:$0xff]  }
 0x196   :  { %5912 = vmatprep.subr.bf16.mxu1 %v6360_v5  ;;  %5940 = vmatprep.subr.bf16.mxu0 %v6361_v30 }
 0x199   :  { %5913 = vmatpush3.bf16.msra.mxu1 %v6362_v3  ;;  %5941 = vmatpush3.bf16.msra.mxu0 %v6363_v15 }
 0x19a   :  { %5914 = vmatprep.subr.bf16.mxu1 %v6364_v32  ;;  %5942 = vmatprep.subr.bf16.mxu0 %v6365_v9 }
 0x19d   :  { %5915 = vmatpush3.bf16.msra.mxu1 %v6366_v35  ;;  %5943 = vmatpush3.bf16.msra.mxu0 %v6367_v58 }
 0x19e   :  { %5916 = vmatprep.subr.bf16.mxu1 %v6368_v61  ;;  %5944 = vmatprep.subr.bf16.mxu0 %v6369_v49 }
 0x1a1   :  { %5917 = vmatpush3.bf16.msra.mxu1 %v6370_v50  ;;  %5945 = vmatpush3.bf16.msra.mxu0 %v6371_v6 }
 0x1a2   :  { %5918 = vmatprep.subr.bf16.mxu1 %v6372_v1  ;;  %5946 = vmatprep.subr.bf16.mxu0 %v6373_v19 }
 0x1a5   :  { %5919 = vmatpush3.bf16.msra.mxu1 %v6374_v43  ;;  %5947 = vmatpush3.bf16.msra.mxu0 %v6375_v26 }
 0x1a6   :  { %5920 = vmatprep.subr.bf16.mxu1 %v6376_v51  ;;  %5948 = vmatprep.subr.bf16.mxu0 %v6377_v27 }
 0x1a9   :  { %5921 = vmatpush3.bf16.msra.mxu1 %v6378_v14  ;;  %5949 = vmatpush3.bf16.msra.mxu0 %v6379_v29 }
 0x1ac   :  { %3060 = vmatmul.mubr.bf16.vlgmr.msra.gmra.mrb[24].mxu1 %v1783_v40  ;;  %3109 = vmatmul.mubr.bf16.vlgmr.msra.gmra.mrb[40].mxu0 %v1784_v42  ;;  %v5417_v40 = vld [vmem:[%s8247_s4] ss:$0 sm:$0xff] }
 0x1ad   :  { %3067 = vmatprep.mubr.bf16.mxu1 %v1931_v4  ;;  %3116 = vmatprep.mubr.bf16.mxu0 %v1932_v25  ;;  %v6380_v4 = vld [vmem:[%s8248_s7 + $0x40] sm:$0xff]  }
 0x1ae   :  { %v6381_v25 = vld [vmem:[%s8248_s7 + $0xc0] sm:$0xff]   ;;  %5962 = vmatprep.subr.bf16.mxu1 %v6380_v4 }
 0x1af   :  { %5990 = vmatprep.subr.bf16.mxu0 %v6381_v25 }
 0x1b4   :  { %3068 = vmatmul.mubr.bf16.gmra.mrb[28].mxu1 %v1927_v59  ;;  %3117 = vmatmul.mubr.bf16.gmra.mrb[44].mxu0 %v1928_v39 }
 0x21d   :  { %v5754_v0 = vpop.f32.mrb[0].mxu1  ;;  %v5782_v52 = vpop.f32.mrb[16].mxu0 }
 0x21e   :  { %v5755_v36 = vpop.f32.mrb[1].mxu1  ;;  %v5783_v47 = vpop.f32.mrb[17].mxu0 }
 0x21f   :  { %v5756_v48 = vadd.f32 %v5755_v36, %v5754_v0  ;;  %v5784_v56 = vadd.f32 %v5783_v47, %v5782_v52  ;;  %v5757_v42 = vpop.f32.mrb[2].mxu1  ;;  %v5785_v41 = vpop.f32.mrb[18].mxu0 }
 0x220   :  { %v5758_v45 = vpop.f32.mrb[3].mxu1  ;;  %v5786_v7 = vpop.f32.mrb[19].mxu0 }
 0x221   :  { %v2768_v17 = vadd.f32 %v5756_v48, %v5417_v40  ;;  %v5759_v59 = vadd.f32 %v5758_v45, %v5757_v42  ;;  %v5787_v11 = vadd.f32 %v5786_v7, %v5785_v41  ;;  %v6382_v48 = vld [vmem:[%s8248_s7] sm:$0xff]   ;;  %v6384_v45 = vld [vmem:[%s8248_s7 + $0x48] sm:$0xff]  }
 0x222   :  { %5963 = vmatpush3.bf16.msra.mxu1 %v6382_v48  ;;  %v6385_v7 = vld [vmem:[%s8248_s7 + $0xc8] sm:$0xff]  }
 0x223   :  { %v2817_v8 = vadd.f32 %v5784_v56, %v2768_v17  ;;  %v2771_v28 = vadd.f32 %v5759_v59, %v5417_v40  ;;  %v6383_v56 = vld [vmem:[%s8248_s7 + $0x80] sm:$0xff]   ;;  %5964 = vmatprep.subr.bf16.mxu1 %v6384_v45  ;;  %v6386_v59 = vld [vmem:[%s8248_s7 + $0x8] sm:$0xff]  }
 0x224   :  { %5991 = vmatpush3.bf16.msra.mxu0 %v6383_v56 }
 0x225   :  { %v2820_v53 = vadd.f32 %v5787_v11, %v2771_v28  ;;  %5992 = vmatprep.subr.bf16.mxu0 %v6385_v7  ;;  %v6387_v11 = vld [vmem:[%s8248_s7 + $0x88] sm:$0xff]   ;;  %v6389_v28 = vld [vmem:[%s8248_s7 + $0xd0] sm:$0xff]  }
 0x226   :  { %5965 = vmatpush3.bf16.msra.mxu1 %v6386_v59 }
 0x228   :  { %5993 = vmatpush3.bf16.msra.mxu0 %v6387_v11 }
 0x229   :  { %v5760_v39 = vpop.f32.mrb[4].mxu1  ;;  %v5788_v46 = vpop.f32.mrb[20].mxu0  ;;  %5994 = vmatprep.subr.bf16.mxu0 %v6389_v28 }
 0x22a   :  { %v5761_v13 = vpop.f32.mrb[5].mxu1  ;;  %v5789_v16 = vpop.f32.mrb[21].mxu0 }
 0x22b   :  { %v5762_v33 = vadd.f32 %v5761_v13, %v5760_v39  ;;  %v5790_v22 = vadd.f32 %v5789_v16, %v5788_v46  ;;  %v5763_v34 = vpop.f32.mrb[6].mxu1  ;;  %v5791_v38 = vpop.f32.mrb[22].mxu0  ;;  %v6391_v39 = vld [vmem:[%s8248_s7 + $0x90] sm:$0xff]   ;;  %v6392_v46 = vld [vmem:[%s8248_s7 + $0x58] sm:$0xff]  }
 0x22c   :  { %v5764_v12 = vpop.f32.mrb[7].mxu1  ;;  %v5792_v54 = vpop.f32.mrb[23].mxu0  ;;  %5995 = vmatpush3.bf16.msra.mxu0 %v6391_v39  ;;  %v6393_v13 = vld [vmem:[%s8248_s7 + $0xd8] sm:$0xff]  }
 0x22d   :  { %v2776_v21 = vadd.f32 %v5762_v33, %v5417_v40  ;;  %v5765_v31 = vadd.f32 %v5764_v12, %v5763_v34  ;;  %v5793_v44 = vadd.f32 %v5792_v54, %v5791_v38  ;;  %v6394_v16 = vld [vmem:[%s8248_s7 + $0x18] sm:$0xff]   ;;  %5996 = vmatprep.subr.bf16.mxu0 %v6393_v13  ;;  %v6397_v34 = vld [vmem:[%s8248_s7 + $0xe0] sm:$0xff]   ;;  %v6400_v54 = vld [vmem:[%s8248_s7 + $0x68] sm:$0xff]  }
 0x22e   :  { %v6395_v33 = vld [vmem:[%s8248_s7 + $0x98] sm:$0xff]   ;;  %v6398_v38 = vld [vmem:[%s8248_s7 + $0x20] sm:$0xff]  }
 0x22f   :  { %v2825_v18 = vadd.f32 %v5790_v22, %v2776_v21  ;;  %v2779_v24 = vadd.f32 %v5765_v31, %v5417_v40  ;;  %v6396_v22 = vld [vmem:[%s8248_s7 + $0x60] sm:$0xff]   ;;  %v6401_v21 = vld [vmem:[%s8248_s7 + $0xe8] sm:$0xff]  }
 0x230   :  { %5997 = vmatpush3.bf16.msra.mxu0 %v6395_v33  ;;  %v6399_v12 = vld [vmem:[%s8248_s7 + $0xa0] sm:$0xff]   ;;  %v6402_v31 = vld [vmem:[%s8248_s7 + $0x28] sm:$0xff]  }
 0x231   :  { %v2828_v37 = vadd.f32 %v5793_v44, %v2779_v24  ;;  %5998 = vmatprep.subr.bf16.mxu0 %v6397_v34  ;;  %v6403_v24 = vld [vmem:[%s8248_s7 + $0xa8] sm:$0xff]  }
 0x234   :  { %5999 = vmatpush3.bf16.msra.mxu0 %v6399_v12 }
 0x235   :  { %6000 = vmatprep.subr.bf16.mxu0 %v6401_v21 }
 0x238   :  { %6001 = vmatpush3.bf16.msra.mxu0 %v6403_v24 }
 0x23d   :  { %v5810_v10 = vpop.f32.mrb[8].mxu1  ;;  %v5838_v20 = vpop.f32.mrb[24].mxu0 }
 0x23e   :  { %v5811_v63 = vpop.f32.mrb[9].mxu1  ;;  %v5839_v62 = vpop.f32.mrb[25].mxu0 }
 0x23f   :  { %v5812_v5 = vadd.f32 %v5811_v63, %v5810_v10  ;;  %v5840_v30 = vadd.f32 %v5839_v62, %v5838_v20  ;;  %v5813_v3 = vpop.f32.mrb[10].mxu1  ;;  %v5841_v15 = vpop.f32.mrb[26].mxu0 }
 0x240   :  { %v5814_v32 = vpop.f32.mrb[11].mxu1  ;;  %v5842_v9 = vpop.f32.mrb[27].mxu0 }
 0x241   :  { %v2866_v35 = vadd.f32 %v5812_v5, %v2817_v8  ;;  %v5815_v58 = vadd.f32 %v5814_v32, %v5813_v3  ;;  %v5843_v61 = vadd.f32 %v5842_v9, %v5841_v15  ;;  %v6388_v8 = vld [vmem:[%s8248_s7 + $0x50] sm:$0xff]  }
 0x242   :  { %5966 = vmatprep.subr.bf16.mxu1 %v6388_v8  ;;  %v6405_v32 = vld [vmem:[%s8248_s7 + $0xf0] sm:$0xff]  }
 0x243   :  { %v7590_v49 = vadd.f32 %v5840_v30, %v2866_v35  ;;  %v2869_v50 = vadd.f32 %v5815_v58, %v2820_v53  ;;  %v6390_v53 = vld [vmem:[%s8248_s7 + $0x10] sm:$0xff]   ;;  %6002 = vmatprep.subr.bf16.mxu0 %v6405_v32 }
 0x244   :  { %5967 = vmatpush3.bf16.msra.mxu1 %v6390_v53  ;;  %v6406_v9 = vld [vmem:[%s8248_s7 + $0x30] sm:$0xff]  }
 0x245   :  { %v7592_v6 = vadd.f32 %v5843_v61, %v2869_v50  ;;  %v5816_v1 = vpop.f32.mrb[12].mxu1  ;;  %v5844_v19 = vpop.f32.mrb[28].mxu0  ;;  %5968 = vmatprep.subr.bf16.mxu1 %v6392_v46  ;;  %v6407_v50 = vld [vmem:[%s8248_s7 + $0xb0] sm:$0xff]  }
 0x246   :  { %v5817_v43 = vpop.f32.mrb[13].mxu1  ;;  %v5845_v26 = vpop.f32.mrb[29].mxu0  ;;  %6003 = vmatpush3.bf16.msra.mxu0 %v6407_v50 }
 0x247   :  { %v5818_v51 = vadd.f32 %v5817_v43, %v5816_v1  ;;  %v5846_v27 = vadd.f32 %v5845_v26, %v5844_v19  ;;  %v5819_v14 = vpop.f32.mrb[14].mxu1  ;;  %v5847_v29 = vpop.f32.mrb[30].mxu0  ;;  %v6408_v43 = vld [vmem:[%s8248_s7 + $0x78] sm:$0xff]  }
 0x248   :  { %v5820_v0 = vpop.f32.mrb[15].mxu1  ;;  %v5848_v52 = vpop.f32.mrb[31].mxu0  ;;  %5969 = vmatpush3.bf16.msra.mxu1 %v6394_v16 }
 0x249   :  { %v2874_v40 = vadd.f32 %v5818_v51, %v2825_v18  ;;  %v5821_v36 = vadd.f32 %v5820_v0, %v5819_v14  ;;  %v5849_v47 = vadd.f32 %v5848_v52, %v5847_v29  ;;  %5970 = vmatprep.subr.bf16.mxu1 %v6396_v22  ;;  %v6410_v14 = vld [vmem:[%s8248_s7 + $0x38] sm:$0xff]  }
 0x24b   :  { %v7606_v42 = vadd.f32 %v5846_v27, %v2874_v40  ;;  %v2877_v41 = vadd.f32 %v5821_v36, %v2828_v37  ;;  %v6404_v37 = vld [vmem:[%s8248_s7 + $0x70] sm:$0xff]   ;;  %v6412_v36 = vld [vmem:[%s8248_s7 + $0x140] sm:$0xff]  }
 0x24c   :  { %5971 = vmatpush3.bf16.msra.mxu1 %v6398_v38 }
 0x24d   :  { %v7614_v17 = vadd.f32 %v5849_v47, %v2877_v41  ;;  %5972 = vmatprep.subr.bf16.mxu1 %v6400_v54  ;;  %v6413_v47 = vld [vmem:[%s8248_s7 + $0x1c0] sm:$0xff]  }
 0x250   :  { %5973 = vmatpush3.bf16.msra.mxu1 %v6402_v31 }
 0x251   :  { %5974 = vmatprep.subr.bf16.mxu1 %v6404_v37 }
 0x254   :  { %5975 = vmatpush3.bf16.msra.mxu1 %v6406_v9 }
 0x255   :  { %5976 = vmatprep.subr.bf16.mxu1 %v6408_v43 }
 0x258   :  { %5977 = vmatpush3.bf16.msra.mxu1 %v6410_v14 }
 0x259   :  { %6018 = vmatprep.subr.bf16.mxu1 %v6412_v36 }
 0x25e   :  { %v5866_v44 = vpop.f32.mrb[16].mxu1  ;;  %v5894_v18 = vpop.f32.mrb[32].mxu0 }
 0x25f   :  { %v5867_v10 = vpop.f32.mrb[17].mxu1  ;;  %v5895_v20 = vpop.f32.mrb[33].mxu0 }
 0x260   :  { %v5868_v63 = vadd.f32 %v5867_v10, %v5866_v44  ;;  %v5896_v62 = vadd.f32 %v5895_v20, %v5894_v18  ;;  %v5869_v5 = vpop.f32.mrb[18].mxu1  ;;  %v5897_v30 = vpop.f32.mrb[34].mxu0 }
 0x261   :  { %v5870_v3 = vpop.f32.mrb[19].mxu1  ;;  %v5898_v15 = vpop.f32.mrb[35].mxu0 }
 0x262   :  { %v2964_v35 = vadd.f32 %v5868_v63, %v7590_v49  ;;  %v5871_v58 = vadd.f32 %v5870_v3, %v5869_v5  ;;  %v5899_v61 = vadd.f32 %v5898_v15, %v5897_v30  ;;  %v6409_v49 = vld [vmem:[%s8248_s7 + $0xf8] sm:$0xff]  }
 0x263   :  { %6004 = vmatprep.subr.bf16.mxu0 %v6409_v49 }
 0x264   :  { %v3013_v1 = vadd.f32 %v5896_v62, %v2964_v35  ;;  %v2967_v19 = vadd.f32 %v5871_v58, %v7592_v6  ;;  %v6411_v6 = vld [vmem:[%s8248_s7 + $0xb8] sm:$0xff]  }
 0x265   :  { %6005 = vmatpush3.bf16.msra.mxu0 %v6411_v6 }
 0x266   :  { %v3016_v26 = vadd.f32 %v5899_v61, %v2967_v19  ;;  %v5872_v51 = vpop.f32.mrb[20].mxu1  ;;  %v5900_v27 = vpop.f32.mrb[36].mxu0  ;;  %6046 = vmatprep.subr.bf16.mxu0 %v6413_v47 }
 0x267   :  { %v5873_v29 = vpop.f32.mrb[21].mxu1  ;;  %v5901_v4 = vpop.f32.mrb[37].mxu0 }
 0x268   :  { %v5874_v25 = vadd.f32 %v5873_v29, %v5872_v51  ;;  %v5902_v0 = vadd.f32 %v5901_v4, %v5900_v27  ;;  %v5875_v52 = vpop.f32.mrb[22].mxu1  ;;  %v5903_v40 = vpop.f32.mrb[38].mxu0 }
 0x269   :  { %v5876_v48 = vpop.f32.mrb[23].mxu1  ;;  %v5904_v56 = vpop.f32.mrb[39].mxu0 }
 0x26a   :  { %v2972_v41 = vadd.f32 %v5874_v25, %v7606_v42  ;;  %v5877_v45 = vadd.f32 %v5876_v48, %v5875_v52  ;;  %v5905_v7 = vadd.f32 %v5904_v56, %v5903_v40 }
 0x26c   :  { %v3021_v59 = vadd.f32 %v5902_v0, %v2972_v41  ;;  %v2975_v11 = vadd.f32 %v5877_v45, %v7614_v17 }
 0x26e   :  { %v3024_v8 = vadd.f32 %v5905_v7, %v2975_v11 }
 0x27f   :  { %v5922_v28 = vpop.f32.mrb[24].mxu1  ;;  %v5950_v53 = vpop.f32.mrb[40].mxu0 }
 0x280   :  { %v5923_v39 = vpop.f32.mrb[25].mxu1  ;;  %v5951_v46 = vpop.f32.mrb[41].mxu0 }
 0x281   :  { %v5924_v13 = vadd.f32 %v5923_v39, %v5922_v28  ;;  %v5952_v16 = vadd.f32 %v5951_v46, %v5950_v53  ;;  %v5925_v33 = vpop.f32.mrb[26].mxu1  ;;  %v5953_v22 = vpop.f32.mrb[42].mxu0 }
 0x282   :  { %v5926_v34 = vpop.f32.mrb[27].mxu1  ;;  %v5954_v38 = vpop.f32.mrb[43].mxu0 }
 0x283   :  { %v3062_v12 = vadd.f32 %v5924_v13, %v3013_v1  ;;  %v5927_v42 = vadd.f32 %v5926_v34, %v5925_v33  ;;  %v5955_v54 = vadd.f32 %v5954_v38, %v5953_v22  ;;  %v5566_v33 = vld [vmem:[%s8249_s5] ss:$0 sm:$0xff] }
 0x285   :  { %v3111_v21 = vadd.f32 %v5952_v16, %v3062_v12  ;;  %v3065_v31 = vadd.f32 %v5927_v42, %v3016_v26  ;;  %v5567_v42 = vld [vmem:[%s8250_s6] ss:$0 sm:$0xff] }
 0x287   :  { %v3114_v44 = vadd.f32 %v5955_v54, %v3065_v31  ;;  %v5928_v18 = vpop.f32.mrb[28].mxu1  ;;  %v5956_v24 = vpop.f32.mrb[44].mxu0  ;;  %v3136_v17 = vmul.f32 %v3111_v21, %v3111_v21 }
 0x288   :  { %v5929_v37 = vpop.f32.mrb[29].mxu1  ;;  %v5957_v10 = vpop.f32.mrb[45].mxu0 }
 0x289   :  { %v3125_v20 = vadd.f32 %v3114_v44, %v3111_v21  ;;  %v3137_v63 = vmul.f32 %v3114_v44, %v3114_v44  ;;  %v5930_v62 = vadd.f32 %v5929_v37, %v5928_v18  ;;  %v5958_v5 = vadd.f32 %v5957_v10, %v5956_v24  ;;  %v5931_v30 = vpop.f32.mrb[30].mxu1  ;;  %v5959_v3 = vpop.f32.mrb[46].mxu0 }
 0x28a   :  { %v5932_v15 = vpop.f32.mrb[31].mxu1  ;;  %v5960_v32 = vpop.f32.mrb[47].mxu0 }
 0x28b   :  { %v3140_v9 = vadd.f32 %v3137_v63, %v3136_v17  ;;  %v3070_v35 = vadd.f32 %v5930_v62, %v3021_v59  ;;  %v5933_v58 = vadd.f32 %v5932_v15, %v5931_v30  ;;  %v5961_v61 = vadd.f32 %v5960_v32, %v5959_v3 }
 0x28d   :  { %v3119_v50 = vadd.f32 %v5958_v5, %v3070_v35  ;;  %v3073_v1 = vadd.f32 %v5933_v58, %v3024_v8 }
 0x28f   :  { %v3126_v19 = vadd.f32 %v3125_v20, %v3119_v50  ;;  %v3138_v43 = vmul.f32 %v3119_v50, %v3119_v50  ;;  %v3122_v49 = vadd.f32 %v5961_v61, %v3073_v1 }
 0x291   :  { %v3141_v26 = vadd.f32 %v3140_v9, %v3138_v43  ;;  %v3127_v51 = vadd.f32 %v3126_v19, %v3122_v49  ;;  %v3139_v27 = vmul.f32 %v3122_v49, %v3122_v49 }
 0x293   :  { %v3128_v14 = vrot.slane %v3127_v51, 4  ;;  %v3142_v6 = vadd.f32 %v3141_v26, %v3139_v27 }
 0x295   :  { %v3129_v29 = vadd.f32 %v3128_v14, %v3127_v51  ;;  %v3143_v4 = vrot.slane %v3142_v6, 4 }
 0x297   :  { %v3130_v25 = vrot.slane %v3129_v29, 2  ;;  %v3144_v0 = vadd.f32 %v3143_v4, %v3142_v6 }
 0x299   :  { %v3131_v52 = vadd.f32 %v3130_v25, %v3129_v29  ;;  %v3145_v40 = vrot.slane %v3144_v0, 2 }
 0x29b   :  { %v3132_v36 = vrot.slane %v3131_v52, 1  ;;  %v3146_v47 = vadd.f32 %v3145_v40, %v3144_v0 }
 0x29d   :  { %v3133_v48 = vadd.f32 %v3132_v36, %v3131_v52  ;;  %v3147_v56 = vrot.slane %v3146_v47, 1 }
 0x29f   :  { %v3135_v41 = vmul.f32 0.03125, %v3133_v48  ;;  %v3148_v45 = vadd.f32 %v3147_v56, %v3146_v47 }
 0x2a1   :  { %v3149_v7 = vmul.f32 0.03125, %v3148_v45  ;;  %v3150_v59 = vmul.f32 %v3135_v41, %v3135_v41  ;;  %v3153_v11 = vsub.f32 %v3111_v21, %v3135_v41  ;;  %v3154_v8 = vsub.f32 %v3114_v44, %v3135_v41 }
 0x2a2   :  { %v3155_v28 = vsub.f32 %v3119_v50, %v3135_v41  ;;  %v3156_v53 = vsub.f32 %v3122_v49, %v3135_v41 }
 0x2a3   :  { %v3151_v39 = vsub.f32 %v3149_v7, %v3150_v59 }
 0x2a5   :  { %v3152_v46 = vmax.f32 %v3151_v39, 0.0 }
 0x2a7   :  { %v3157_v13 = vadd.f32 1e-05, %v3152_v46 }
 0x2a9   :  { %6508 = vrsqrt.f32 %v3157_v13 }
 0x2b3   :  { %v6509_v16 = vpop.eup %6508 }
 0x2b4   :  { %v3159_v22 = vmul.f32 %v6509_v16, %v3153_v11  ;;  %v3160_v34 = vmul.f32 %v6509_v16, %v3154_v8  ;;  %v3161_v38 = vmul.f32 %v6509_v16, %v3155_v28  ;;  %v3162_v12 = vmul.f32 %v6509_v16, %v3156_v53 }
 0x2b6   :  { %v3170_v54 = vmul.f32 %v5566_v33, %v3159_v22  ;;  %v3171_v21 = vmul.f32 %v5566_v33, %v3160_v34  ;;  %v3172_v31 = vmul.f32 %v5566_v33, %v3161_v38  ;;  %v3173_v44 = vmul.f32 %v5566_v33, %v3162_v12 }
 0x2b8   :  { %v3181_v18 = vadd.f32 %v5567_v42, %v3170_v54  ;;  %v3182_v24 = vadd.f32 %v5567_v42, %v3171_v21  ;;  %v3183_v17 = vadd.f32 %v5567_v42, %v3172_v31  ;;  %v3184_v37 = vadd.f32 %v5567_v42, %v3173_v44 }
 0x2ba   :  { %v3185_v10 = vmul.f32 0.2, %v3181_v18  ;;  %v3186_v20 = vmul.f32 0.2, %v3182_v24  ;;  %v3187_v63 = vmul.f32 0.2, %v3183_v17 }
 0x2bb   :  { %v3188_v62 = vmul.f32 0.2, %v3184_v37 }
 0x2bc   :  { %v3189_v5 = vmax.f32 %v3181_v18, %v3185_v10  ;;  %v3190_v30 = vmax.f32 %v3182_v24, %v3186_v20  ;;  %v3191_v3 = vmax.f32 %v3183_v17, %v3187_v63 }
 0x2bd   :  { %v3192_v15 = vmax.f32 %v3184_v37, %v3188_v62 }
 0x2be   :  { %v3193_v32 = vpack.c.bf16 %v3190_v30, %v3189_v5  ;;  %v5568_v9 = vpack.c.bf16 %v3190_v30, %v3190_v30 }
 0x2bf   :  { %v3194_v35 = vpack.c.bf16 %v3192_v15, %v3191_v3  ;;  %v5569_v58 = vpack.c.bf16 %v3192_v15, %v3192_v15 }
 0x2c0   :  { %v3204_v61 = vrot.slane %v3193_v32, %v6726_v57  ;;  %v3211_v50 = vrot.slane %v5568_v9, %v6726_v57 }
 0x2c1   :  { %v3253_v1 = vrot.slane %v3194_v35, %v6726_v57  ;;  %v7716_v51 = vrot.slane %v5569_v58, %v6726_v57 }
 0x2c2   :  { %v3212_v19 = vcombine.high %v3204_v61, %v3204_v61  ;;  %v3213_v43 = vcombine.high %v3211_v50, %v3211_v50  ;;  %v3227_v49 = vrot.slane %v3211_v50, %v6726_v57  ;;  %v3220_v26 = vrot.slane %v3204_v61, %v6726_v57 }
 0x2c3   :  { %v3261_v27 = vcombine.high %v3253_v1, %v3253_v1  ;;  %v3269_v25 = vrot.slane %v3253_v1, %v6726_v57 }
 0x2c4   :  { %v3241_v14 = vrot.slane %v3213_v43, %v6726_v57  ;;  %v3234_v6 = vrot.slane %v3212_v19, %v6726_v57  ;;  %v3242_v29 = vcombine.high %v3220_v26, %v3220_v26  ;;  %v3243_v4 = vcombine.high %v3227_v49, %v3227_v49 }
 0x2c5   :  { %v3283_v0 = vrot.slane %v3261_v27, %v6726_v57  ;;  %v3295_v52 = vcombine.low %v6523_v55, %v3220_v26  ;;  %v3320_v40 = vcombine.low %v6523_v55, %v3227_v49  ;;  %v3291_v38 = vcombine.high %v3269_v25, %v3269_v25 }
 0x2c6   :  { %v3244_v36 = vcombine.high %v3234_v6, %v3234_v6  ;;  %v3296_v47 = vcombine.low %v3234_v6, %v3242_v29  ;;  %v3321_v48 = vcombine.low %v3241_v14, %v3243_v4  ;;  %v3369_v56 = vcombine.low %v3220_v26, %v3234_v6 }
 0x2c7   :  { %v3303_v41 = vrot.slane %v3295_v52, %v6726_v57  ;;  %v3330_v45 = vrot.slane %v3320_v40, %v6726_v57  ;;  %v5570_v7 = vcombine.high %v3220_v26, %v3234_v6  ;;  %v3394_v59 = vcombine.low %v3227_v49, %v3241_v14 }
 0x2c8   :  { %v3310_v11 = vrot.slane %v3296_v47, %v6726_v57  ;;  %v3337_v8 = vrot.slane %v3321_v48, %v6726_v57  ;;  %v3377_v28 = vrot.slane %v3369_v56, %v6726_v57  ;;  %v5571_v53 = vcombine.high %v3227_v49, %v3241_v14 }
 0x2c9   :  { %v3384_v39 = vrot.slane %v5570_v7, %v6726_v57  ;;  %v3404_v46 = vrot.slane %v3394_v59, %v6726_v57  ;;  %v3443_v13 = vcombine.low %v3244_v36, %v6523_v55  ;;  %v3245_v16 = vcombine.high %v3241_v14, %v3241_v14 }
 0x2ca   :  { %v3311_v33 = vcombine.low %v3303_v41, %v3310_v11  ;;  %v3352_v22 = vcombine.low %v3330_v45, %v3337_v8  ;;  %v3411_v34 = vrot.slane %v5571_v53, %v6726_v57  ;;  %v3293_v54 = vcombine.high %v3283_v0, %v3283_v0 }
 0x2cb   :  { %v3385_v12 = vcombine.low %v3377_v28, %v3384_v39  ;;  %v3450_v42 = vrot.slane %v3443_v13, %v6726_v57  ;;  %v3460_v21 = vcombine.low %v3245_v16, %v6523_v55  ;;  %v3323_v24 = vcombine.low %v3283_v0, %v3291_v38 }
 0x2cc   :  { %v3318_v31 = vrot.slane %v3311_v33, %v6726_v57  ;;  %v3360_v44 = vrot.slane %v3352_v22, %v6726_v57  ;;  %v3426_v18 = vcombine.low %v3404_v46, %v3411_v34  ;;  %v3461_v10 = vcombine.low %v3293_v54, %v6523_v55  ;;  %v6415_v54 = vld [vmem:[%s8248_s7 + $0x180] sm:$0xff]  }
 0x2cd   :  { %v3392_v17 = vrot.slane %v3385_v12, %v6726_v57  ;;  %v3451_v37 = vcombine.low %v3310_v11, %v3450_v42  ;;  %v3468_v20 = vrot.slane %v3460_v21, %v6726_v57  ;;  %v3351_v5 = vrot.slane %v3323_v24, %v6726_v57  ;;  %v6414_v42 = vld [vmem:[%s8248_s7 + $0x100] sm:$0xff]   ;;  %v6417_v24 = vld [vmem:[%s8248_s7 + $0x1c8] sm:$0xff]  }
 0x2ce   :  { %v3434_v63 = vrot.slane %v3426_v18, %v6726_v57  ;;  %v5577_v62 = vcombine.low %v6730_v60, %v3318_v31  ;;  %v3322_v30 = vcombine.low %v6523_v55, %v3269_v25  ;;  %v3475_v15 = vrot.slane %v3461_v10, %v6726_v57 }
 0x2cf   :  { %v3458_v3 = vrot.slane %v3451_v37, %v6726_v57  ;;  %v3476_v32 = vcombine.low %v3337_v8, %v3468_v20  ;;  %v3396_v9 = vcombine.low %v3269_v25, %v3283_v0  ;;  %v5572_v50 = vcombine.high %v3269_v25, %v3283_v0  ;;  %v6418_v20 = vld [vmem:[%s8248_s7 + $0x108] sm:$0xff]  }
 0x2d0   :  { %v5581_v35 = vcombine.low %v3360_v44, %v3434_v63  ;;  %v3857_v58 = vrot.slane %v5577_v62, %v6726_v57  ;;  %v3344_v61 = vrot.slane %v3322_v30, %v6726_v57  ;;  %v3477_v19 = vcombine.low %v3351_v5, %v3475_v15  ;;  %v6420_v15 = vld [vmem:[%s8248_s7 + $0x150] sm:$0xff]  }
 0x2d1   :  { %v5579_v1 = vcombine.low %v3392_v17, %v3458_v3  ;;  %v7749_v43 = vrot.slane %v3476_v32, %v6726_v57  ;;  %v3418_v49 = vrot.slane %v3396_v9, %v6726_v57  ;;  %v3425_v25 = vrot.slane %v5572_v50, %v6726_v57  ;;  %v6421_v32 = vld [vmem:[%s8248_s7 + $0x1d0] sm:$0xff]  }
 0x2d2   :  { %v7753_v26 = vrot.slane %v5581_v35, %v6726_v57  ;;  %v3893_v27 = vcombine.low %v6741_v2, %v3857_v58  ;;  %v3894_v14 = vcombine.high %v6741_v2, %v3857_v58  ;;  %v3353_v6 = vcombine.low %v3344_v61, %v3351_v5 }
 0x2d3   :  { %v3871_v29 = vrot.slane %v5579_v1, %v6726_v57  ;;  %v7759_v4 = vrot.slane %v3477_v19, %v6726_v57  ;;  %v5576_v0 = vcombine.low %v3318_v31, %v3392_v17  ;;  %v3262_v52 = vcombine.high %v7716_v51, %v7716_v51 }
 0x2d4   :  { %v3921_v40 = vrot.slane %v3894_v14, %v6726_v57  ;;  %v3907_v36 = vrot.slane %v3893_v27, %v6726_v57  ;;  %v5578_v47 = vcombine.low %v3458_v3, %v3360_v44  ;;  %v3427_v45 = vcombine.low %v3418_v49, %v3425_v25 }
 0x2d5   :  { %v3897_v48 = vcombine.low %v3871_v29, %v7753_v26  ;;  %v3898_v56 = vcombine.high %v3871_v29, %v7753_v26  ;;  %v3492_v41 = vcombine.low %v7749_v43, %v7759_v4  ;;  %v7771_v7 = vrot.slane %v3353_v6, %v6726_v57  ;;  %v6422_v6 = vld [vmem:[%s8248_s7 + $0x110] sm:$0xff]  }
 0x2d6   :  { %v5580_v59 = vcombine.low %v3434_v63, %v7749_v43  ;;  %v3850_v11 = vrot.slane %v5576_v0, %v6726_v57  ;;  %v3864_v8 = vrot.slane %v5578_v47, %v6726_v57  ;;  %v7780_v46 = vrot.slane %v3427_v45, %v6726_v57  ;;  %v6419_v63 = vld [vmem:[%s8248_s7 + $0x188] sm:$0xff]   ;;  %v6423_v29 = vld [vmem:[%s8248_s7 + $0x190] sm:$0xff]   ;;  %v6424_v47 = vld [vmem:[%s8248_s7 + $0x158] sm:$0xff]  }
 0x2d7   :  { %v3949_v28 = vrot.slane %v3898_v56, %v6726_v57  ;;  %v3935_v53 = vrot.slane %v3897_v48, %v6726_v57  ;;  %v4092_v39 = vrot.slane %v3492_v41, %v6726_v57  ;;  %v7784_v13 = vrot.slane %v7716_v51, %v6726_v57  ;;  %v6416_v51 = vld [vmem:[%s8248_s7 + $0x148] sm:$0xff]   ;;  %v6425_v48 = vld [vmem:[%s8248_s7 + $0x1d8] sm:$0xff]  }
 0x2d8   :  { %v3895_v16 = vcombine.low %v3850_v11, %v3864_v8  ;;  %v3896_v33 = vcombine.high %v3850_v11, %v3864_v8  ;;  %v5582_v31 = vcombine.low %v7771_v7, %v7780_v46  ;;  %v3878_v44 = vrot.slane %v5580_v59, %v6726_v57  ;;  %v6426_v11 = vld [vmem:[%s8248_s7 + $0x118] sm:$0xff]  }
 0x2d9   :  { %v3961_v22 = vcombine.low %v3921_v40, %v3949_v28  ;;  %v3962_v34 = vcombine.high %v3921_v40, %v3949_v28  ;;  %v3957_v38 = vcombine.low %v3907_v36, %v3935_v53  ;;  %v3958_v12 = vcombine.high %v3907_v36, %v3935_v53  ;;  %v6427_v8 = vld [vmem:[%s8248_s7 + $0x198] sm:$0xff]  }
 0x2da   :  { %v4100_v21 = vcombine.high %v4092_v39, %v4092_v39  ;;  %v7799_v18 = vrot.slane %v3262_v52, %v6726_v57  ;;  %v4108_v17 = vrot.slane %v4092_v39, %v6726_v57  ;;  %v7807_v10 = vrot.slane %v5582_v31, %v6726_v57  ;;  %v6433_v31 = vld [vmem:[%s8248_s7 + $0x1e8] sm:$0xff]  }
 0x2db   :  { %5015 = vmatprep.mubr.bf16.mxu1 %v3961_v22  ;;  %5063 = vmatprep.mubr.bf16.mxu0 %v3962_v34  ;;  %v3928_v62 = vrot.slane %v3896_v33, %v6726_v57  ;;  %v7817_v5 = vrot.slane %v3895_v16, %v6726_v57  ;;  %v3292_v30 = vcombine.high %v7784_v13, %v7784_v13  ;;  %v6429_v16 = vld [vmem:[%s8248_s7 + $0x1e0] sm:$0xff]  }
 0x2dc   :  { %5016 = vmatmul.mubr.bf16.vlgmr.msra.gmra.mrb[32].mxu1 %v3957_v38  ;;  %5064 = vmatmul.mubr.bf16.vlgmr.msra.gmra.mrb[48].mxu0 %v3958_v12  ;;  %v4122_v37 = vrot.slane %v4100_v21, %v6726_v57  ;;  %v3899_v9 = vcombine.low %v3878_v44, %v7807_v10  ;;  %v3900_v35 = vcombine.high %v3878_v44, %v7807_v10 }
 0x2dd   :  { %6019 = vmatpush3.bf16.msra.mxu1 %v6414_v42  ;;  %6047 = vmatpush3.bf16.msra.mxu0 %v6415_v54  ;;  %v4130_v58 = vcombine.high %v4108_v17, %v4108_v17  ;;  %v3494_v61 = vcombine.low %v6523_v55, %v7784_v13  ;;  %v3495_v50 = vcombine.low %v7799_v18, %v3292_v30  ;;  %v6430_v42 = vld [vmem:[%s8248_s7 + $0x120] sm:$0xff]  }
 0x2de   :  { %5023 = vmatprep.mubr.bf16.mxu1 %v4122_v37  ;;  %v4132_v3 = vcombine.high %v4122_v37, %v4122_v37  ;;  %6020 = vmatprep.subr.bf16.mxu1 %v6416_v51  ;;  %v3520_v1 = vcombine.low %v7784_v13, %v7799_v18  ;;  %v3956_v19 = vrot.slane %v3900_v35, %v6726_v57  ;;  %v6432_v51 = vld [vmem:[%s8248_s7 + $0x168] sm:$0xff]  }
 0x2df   :  { %6048 = vmatprep.subr.bf16.mxu0 %v6417_v24  ;;  %v7836_v49 = vrot.slane %v3899_v9, %v6726_v57  ;;  %v5573_v27 = vcombine.high %v7784_v13, %v7799_v18  ;;  %v5583_v14 = vcombine.low %v7749_v43, %v7771_v7  ;;  %v3502_v25 = vrot.slane %v3494_v61, %v6726_v57  ;;  %v6428_v13 = vld [vmem:[%s8248_s7 + $0x160] sm:$0xff]  }
 0x2e0   :  { %5071 = vmatprep.mubr.bf16.mxu0 %v4132_v3  ;;  %v3509_v0 = vrot.slane %v3495_v50, %v6726_v57  ;;  %v3528_v52 = vrot.slane %v3520_v1, %v6726_v57  ;;  %v3963_v40 = vcombine.low %v3928_v62, %v3956_v19  ;;  %v3964_v43 = vcombine.high %v3928_v62, %v3956_v19  ;;  %v6434_v62 = vld [vmem:[%s8248_s7 + $0x128] sm:$0xff]   ;;  %v6438_v1 = vld [vmem:[%s8248_s7 + $0x130] sm:$0xff]  }
 0x2e1   :  { %6021 = vmatpush3.bf16.msra.mxu1 %v6418_v20  ;;  %6049 = vmatpush3.bf16.msra.mxu0 %v6419_v63  ;;  %v3959_v36 = vcombine.low %v7817_v5, %v7836_v49  ;;  %v3960_v56 = vcombine.high %v7817_v5, %v7836_v49  ;;  %v3535_v45 = vrot.slane %v5573_v27, %v6726_v57  ;;  %v6439_v19 = vld [vmem:[%s8248_s7 + $0x1b0] sm:$0xff]  }
 0x2e2   :  { %6022 = vmatprep.subr.bf16.mxu1 %v6420_v15  ;;  %6050 = vmatprep.subr.bf16.mxu0 %v6421_v32  ;;  %v3510_v41 = vcombine.low %v3502_v25, %v3509_v0  ;;  %v3977_v7 = vrot.slane %v5583_v14, %v6726_v57  ;;  %v3294_v59 = vcombine.high %v7799_v18, %v7799_v18  ;;  %v6436_v15 = vld [vmem:[%s8248_s7 + $0x170] sm:$0xff]   ;;  %v6441_v25 = vld [vmem:[%s8248_s7 + $0x1f8] sm:$0xff]  }
 0x2e3   :  { %v3536_v53 = vcombine.low %v3528_v52, %v3535_v45  ;;  %v5585_v39 = vcombine.low %v7780_v46, %v7759_v4  ;;  %v5589_v44 = vcombine.low %v7759_v4, %v7759_v4  ;;  %v6437_v32 = vld [vmem:[%s8248_s7 + $0x1f0] sm:$0xff]   ;;  %v6443_v45 = vld [vmem:[%s8248_s7 + $0x1b8] sm:$0xff]  }
 0x2e4   :  { %5024 = vmatmul.mubr.bf16.gmra.mrb[36].mxu1 %v4108_v17  ;;  %5072 = vmatmul.mubr.bf16.gmra.mrb[52].mxu0 %v4130_v58  ;;  %v3517_v28 = vrot.slane %v3510_v41, %v6726_v57  ;;  %v4013_v33 = vcombine.low %v7753_v26, %v3977_v7  ;;  %v4014_v22 = vcombine.high %v7753_v26, %v3977_v7  ;;  %v6431_v26 = vld [vmem:[%s8248_s7 + $0x1a0] sm:$0xff]   ;;  %v6442_v41 = vld [vmem:[%s8248_s7 + $0x138] sm:$0xff]   ;;  %v6452_v5 = vld [vmem:[%s8248_s7 + $0x250] sm:$0xff]  }
 0x2e5   :  { %6023 = vmatpush3.bf16.msra.mxu1 %v6422_v6  ;;  %6051 = vmatpush3.bf16.msra.mxu0 %v6423_v29  ;;  %v3546_v34 = vcombine.low %v3294_v59, %v6523_v55  ;;  %v3543_v46 = vrot.slane %v3536_v53, %v6726_v57  ;;  %v3991_v55 = vrot.slane %v5585_v39, %v6726_v57  ;;  %v6440_v29 = vld [vmem:[%s8248_s7 + $0x178] sm:$0xff]   ;;  %v6453_v49 = vld [vmem:[%s8248_s7 + $0x2d0] sm:$0xff]  }
 0x2e6   :  { %5111 = vmatprep.mubr.bf16.mxu1 %v3963_v40  ;;  %5159 = vmatprep.mubr.bf16.mxu0 %v3964_v43  ;;  %v5584_v38 = vcombine.low %v7759_v4, %v3517_v28  ;;  %v7906_v20 = vrot.slane %v4014_v22, %v6726_v57  ;;  %v6435_v4 = vld [vmem:[%s8248_s7 + $0x1a8] sm:$0xff]   ;;  %v4099_v9 = vrot.slane %v5589_v44, %v6726_v57  ;;  %v6447_v22 = vld [vmem:[%s8248_s7 + $0x280] sm:$0xff]  }
 0x2e7   :  { %6024 = vmatprep.subr.bf16.mxu1 %v6424_v47  ;;  %6052 = vmatprep.subr.bf16.mxu0 %v6425_v48  ;;  %v3553_v12 = vrot.slane %v3546_v34, %v6726_v57  ;;  %v5587_v54 = vcombine.low %v3517_v28, %v3543_v46  ;;  %v6460_v44 = vld [vmem:[%s8248_s7 + $0x260] sm:$0xff]  }
 0x2e8   :  { %v3984_v21 = vrot.slane %v5584_v38, %v6726_v57  ;;  %v6449_v38 = vld [vmem:[%s8248_s7 + $0x2c8] sm:$0xff]  }
 0x2e9   :  { %6025 = vmatpush3.bf16.msra.mxu1 %v6426_v11  ;;  %6053 = vmatpush3.bf16.msra.mxu0 %v6427_v8  ;;  %v3554_v18 = vcombine.low %v3509_v0, %v3553_v12  ;;  %v4005_v24 = vrot.slane %v5587_v54, %v6726_v57  ;;  %v4101_v0 = vcombine.high %v4099_v9, %v4099_v9  ;;  %v6444_v11 = vld [vmem:[%s8248_s7 + $0x240] sm:$0xff]   ;;  %v6450_v12 = vld [vmem:[%s8248_s7 + $0x208] sm:$0xff]   ;;  %v6455_v54 = vld [vmem:[%s8248_s7 + $0x290] sm:$0xff]  }
 0x2ea   :  { %6026 = vmatprep.subr.bf16.mxu1 %v6428_v13  ;;  %6054 = vmatprep.subr.bf16.mxu0 %v6429_v16  ;;  %v4015_v17 = vcombine.low %v7807_v10, %v3984_v21  ;;  %v4016_v37 = vcombine.high %v7807_v10, %v3984_v21  ;;  %v7918_v10 = vrot.slane %v4013_v33, %v6726_v57  ;;  %v6445_v8 = vld [vmem:[%s8248_s7 + $0x2c0] sm:$0xff]   ;;  %v6457_v21 = vld [vmem:[%s8248_s7 + $0x2d8] sm:$0xff]  }
 0x2eb   :  { %v7909_v63 = vrot.slane %v3554_v18, %v6726_v57  ;;  %v4017_v30 = vcombine.low %v3991_v55, %v4005_v24  ;;  %v4018_v3 = vcombine.high %v3991_v55, %v4005_v24  ;;  %v4129_v28 = vrot.slane %v4101_v0, %v6726_v57  ;;  %v6446_v33 = vld [vmem:[%s8248_s7 + $0x200] sm:$0xff]   ;;  %v6456_v55 = vld [vmem:[%s8248_s7 + $0x258] sm:$0xff]  }
 0x2ec   :  { %v7958_v47 = vrot.slane %v4016_v37, %v6726_v57  ;;  %v7961_v48 = vrot.slane %v4015_v17, %v6726_v57  ;;  %v6461_v18 = vld [vmem:[%s8248_s7 + $0x2e0] sm:$0xff]   ;;  %v6464_v37 = vld [vmem:[%s8248_s7 + $0x268] sm:$0xff]  }
 0x2ed   :  { %6027 = vmatpush3.bf16.msra.mxu1 %v6430_v42  ;;  %6055 = vmatpush3.bf16.msra.mxu0 %v6431_v26  ;;  %v5586_v35 = vcombine.low %v3543_v46, %v7909_v63  ;;  %v7929_v58 = vrot.slane %v4018_v3, %v6726_v57  ;;  %v7932_v61 = vrot.slane %v4017_v30, %v6726_v57  ;;  %v6448_v46 = vld [vmem:[%s8248_s7 + $0x248] sm:$0xff]   ;;  %v6462_v24 = vld [vmem:[%s8248_s7 + $0x220] sm:$0xff]   ;;  %v6468_v3 = vld [vmem:[%s8248_s7 + $0x270] sm:$0xff]  }
 0x2ee   :  { %6028 = vmatprep.subr.bf16.mxu1 %v6432_v51  ;;  %6056 = vmatprep.subr.bf16.mxu0 %v6433_v31  ;;  %v4133_v34 = vcombine.high %v4129_v28, %v4129_v28  ;;  %v6451_v42 = vld [vmem:[%s8248_s7 + $0x288] sm:$0xff]   ;;  %v4115_v26 = vrot.slane %v4099_v9, %v6726_v57  ;;  %v6458_v51 = vld [vmem:[%s8248_s7 + $0x218] sm:$0xff]   ;;  %v6463_v17 = vld [vmem:[%s8248_s7 + $0x2a0] sm:$0xff]  }
 0x2ef   :  { %v3998_v50 = vrot.slane %v5586_v35, %v6726_v57  ;;  %v4081_v27 = vcombine.low %v7906_v20, %v7929_v58  ;;  %v4082_v14 = vcombine.high %v7906_v20, %v7929_v58  ;;  %v4077_v6 = vcombine.low %v7918_v10, %v7932_v61  ;;  %v6459_v31 = vld [vmem:[%s8248_s7 + $0x298] sm:$0xff]   ;;  %v6465_v20 = vld [vmem:[%s8248_s7 + $0x2e8] sm:$0xff]  }
 0x2f0   :  { %v4078_v52 = vcombine.high %v7918_v10, %v7932_v61  ;;  %v6467_v30 = vld [vmem:[%s8248_s7 + $0x2a8] sm:$0xff]   ;;  %v6472_v9 = vld [vmem:[%s8248_s7 + $0x278] sm:$0xff]   ;;  %v6484_v10 = vld [vmem:[%s8248_s7 + $0x350] sm:$0xff]  }
 0x2f1   :  { %6029 = vmatpush3.bf16.msra.mxu1 %v6434_v62  ;;  %6057 = vmatpush3.bf16.msra.mxu0 %v6435_v4  ;;  %v4019_v40 = vcombine.low %v3998_v50, %v6741_v2  ;;  %v4020_v43 = vcombine.high %v3998_v50, %v6741_v2  ;;  %v3565_v62 = vcombine.low %v7909_v63, %v6730_v60  ;;  %v6466_v4 = vld [vmem:[%s8248_s7 + $0x228] sm:$0xff]   ;;  %v6469_v60 = vld [vmem:[%s8248_s7 + $0x2f0] sm:$0xff]   ;;  %v6473_v35 = vld [vmem:[%s8248_s7 + $0x2f8] sm:$0xff]  }
 0x2f2   :  { %6030 = vmatprep.subr.bf16.mxu1 %v6436_v15  ;;  %6058 = vmatprep.subr.bf16.mxu0 %v6437_v32  ;;  %v6470_v15 = vld [vmem:[%s8248_s7 + $0x230] sm:$0xff]   ;;  %v6474_v50 = vld [vmem:[%s8248_s7 + $0x238] sm:$0xff]  }
 0x2f3   :  { %v7970_v7 = vrot.slane %v4020_v43, %v6726_v57  ;;  %v7973_v59 = vrot.slane %v4019_v40, %v6726_v57  ;;  %v4141_v63 = vrot.slane %v3565_v62, %v6726_v57  ;;  %v6471_v32 = vld [vmem:[%s8248_s7 + $0x2b0] sm:$0xff]   ;;  %v6480_v40 = vld [vmem:[%s8248_s7 + $0x348] sm:$0xff]  }
 0x2f4   :  { %v8114_v43 = vld [vmem:[%s8248_s7 + $0x3c8] sm:$0xff]   ;;  %v8139_v61 = vld [vmem:[%s8248_s7 + $0x3d0] sm:$0xff]  }
 0x2f5   :  { %6031 = vmatpush3.bf16.msra.mxu1 %v6438_v1  ;;  %6059 = vmatpush3.bf16.msra.mxu0 %v6439_v19  ;;  %v4083_v53 = vcombine.low %v7958_v47, %v7970_v7  ;;  %v4084_v39 = vcombine.high %v7958_v47, %v7970_v7  ;;  %v4079_v13 = vcombine.low %v7961_v48, %v7973_v59  ;;  %v6475_v1 = vld [vmem:[%s8248_s7 + $0x2b8] sm:$0xff]   ;;  %v6476_v19 = vld [vmem:[%s8248_s7 + $0x340] sm:$0xff]  }
 0x2f6   :  { %6032 = vmatprep.subr.bf16.mxu1 %v6440_v29  ;;  %6060 = vmatprep.subr.bf16.mxu0 %v6441_v25  ;;  %v4080_v16 = vcombine.high %v7961_v48, %v7973_v59  ;;  %v4149_v58 = vcombine.high %v4141_v63, %v4141_v63  ;;  %v6478_v29 = vld [vmem:[%s8248_s7 + $0x300] sm:$0xff]  }
 0x2f7   :  { %v8106_v25 = vld [vmem:[%s8248_s7 + $0x380] sm:$0xff]  }
 0x2f8   :  { %v6493_v47 = vld [vmem:[%s8248_s7 + $0x3e0] sm:$0xff]  }
 0x2f9   :  { %6033 = vmatpush3.bf16.msra.mxu1 %v6442_v41  ;;  %6061 = vmatpush3.bf16.msra.mxu0 %v6443_v45  ;;  %v6482_v41 = vld [vmem:[%s8248_s7 + $0x308] sm:$0xff]   ;;  %v6494_v7 = vld [vmem:[%s8248_s7 + $0x320] sm:$0xff]  }
 0x2fa   :  { %6074 = vmatprep.subr.bf16.mxu1 %v6444_v11  ;;  %6102 = vmatprep.subr.bf16.mxu0 %v6445_v8  ;;  %v8129_v45 = vld [vmem:[%s8248_s7 + $0x388] sm:$0xff]   ;;  %v6486_v11 = vld [vmem:[%s8248_s7 + $0x310] sm:$0xff]  }
 0x2fb   :  { %v6487_v8 = vld [vmem:[%s8248_s7 + $0x390] sm:$0xff]  }
 0x2fc   :  { %5112 = vmatmul.mubr.bf16.vlgmr.msra.gmra.mrb[40].mxu1 %v3959_v36  ;;  %5160 = vmatmul.mubr.bf16.vlgmr.msra.gmra.mrb[56].mxu0 %v3960_v56  ;;  %v4131_v36 = vcombine.high %v4115_v26, %v4115_v26  ;;  %v6454_v56 = vld [vmem:[%s8248_s7 + $0x210] sm:$0xff]  }
 0x2fd   :  { %5119 = vmatprep.mubr.bf16.mxu1 %v4129_v28  ;;  %5167 = vmatprep.mubr.bf16.mxu0 %v4133_v34  ;;  %v6488_v28 = vld [vmem:[%s8248_s7 + $0x358] sm:$0xff]  }
 0x2fe   :  { %6075 = vmatpush3.bf16.msra.mxu1 %v6446_v33  ;;  %6103 = vmatpush3.bf16.msra.mxu0 %v6447_v22  ;;  %v6489_v33 = vld [vmem:[%s8248_s7 + $0x3d8] sm:$0xff]  }
 0x2ff   :  { %6076 = vmatprep.subr.bf16.mxu1 %v6448_v46  ;;  %6104 = vmatprep.subr.bf16.mxu0 %v6449_v38  ;;  %v6490_v22 = vld [vmem:[%s8248_s7 + $0x318] sm:$0xff]   ;;  %v6496_v46 = vld [vmem:[%s8248_s7 + $0x368] sm:$0xff]  }
 0x300   :  { %v6491_v34 = vld [vmem:[%s8248_s7 + $0x398] sm:$0xff]   ;;  %v6497_v38 = vld [vmem:[%s8248_s7 + $0x3e8] sm:$0xff]  }
 0x302   :  { %6077 = vmatpush3.bf16.msra.mxu1 %v6450_v12  ;;  %6105 = vmatpush3.bf16.msra.mxu0 %v6451_v42  ;;  %v6498_v12 = vld [vmem:[%s8248_s7 + $0x328] sm:$0xff]  }
 0x303   :  { %6078 = vmatprep.subr.bf16.mxu1 %v6452_v5  ;;  %6106 = vmatprep.subr.bf16.mxu0 %v6453_v49  ;;  %v6499_v42 = vld [vmem:[%s8248_s7 + $0x3a8] sm:$0xff]   ;;  %v6501_v5 = vld [vmem:[%s8248_s7 + $0x3f0] sm:$0xff]  }
 0x304   :  { %5120 = vmatmul.mubr.bf16.gmra.mrb[44].mxu1 %v4115_v26  ;;  %5168 = vmatmul.mubr.bf16.gmra.mrb[60].mxu0 %v4131_v36  ;;  %v6500_v26 = vld [vmem:[%s8248_s7 + $0x370] sm:$0xff]  }
 0x305   :  { %5207 = vmatprep.mubr.bf16.mxu1 %v4081_v27  ;;  %5255 = vmatprep.mubr.bf16.mxu0 %v4082_v14  ;;  %v8096_v27 = vld [vmem:[%s8248_s7 + $0x3c0] sm:$0xff]   ;;  %v4171_v14 = vrot.slane %v4149_v58, %v6726_v57  ;;  %v6502_v49 = vld [vmem:[%s8248_s7 + $0x330] sm:$0xff]  }
 0x306   :  { %6079 = vmatpush3.bf16.msra.mxu1 %v6454_v56  ;;  %6107 = vmatpush3.bf16.msra.mxu0 %v6455_v54  ;;  %v6503_v36 = vld [vmem:[%s8248_s7 + $0x3b0] sm:$0xff]   ;;  %v6504_v56 = vld [vmem:[%s8248_s7 + $0x378] sm:$0xff]  }
 0x307   :  { %6080 = vmatprep.subr.bf16.mxu1 %v6456_v55  ;;  %6108 = vmatprep.subr.bf16.mxu0 %v6457_v21  ;;  %v4181_v0 = vcombine.high %v4171_v14, %v4171_v14  ;;  %v6505_v54 = vld [vmem:[%s8248_s7 + $0x3f8] sm:$0xff]  }
 0x308   :  { %v6506_v55 = vld [vmem:[%s8248_s7 + $0x338] sm:$0xff]  }
 0x309   :  { %v6507_v21 = vld [vmem:[%s8248_s7 + $0x3b8] sm:$0xff]  }
 0x30a   :  { %6081 = vmatpush3.bf16.msra.mxu1 %v6458_v51  ;;  %6109 = vmatpush3.bf16.msra.mxu0 %v6459_v31  ;;  %v4164_v51 = vrot.slane %v6741_v2, %v6726_v57  ;;  %v4182_v31 = vcombine.high %v6754_v23, %v6754_v23 }
 0x30b   :  { %6082 = vmatprep.subr.bf16.mxu1 %v6460_v44  ;;  %6110 = vmatprep.subr.bf16.mxu0 %v6461_v18 }
 0x30e   :  { %6083 = vmatpush3.bf16.msra.mxu1 %v6462_v24  ;;  %6111 = vmatpush3.bf16.msra.mxu0 %v6463_v17 }
 0x30f   :  { %6084 = vmatprep.subr.bf16.mxu1 %v6464_v37  ;;  %6112 = vmatprep.subr.bf16.mxu0 %v6465_v20 }
 0x312   :  { %6085 = vmatpush3.bf16.msra.mxu1 %v6466_v4  ;;  %6113 = vmatpush3.bf16.msra.mxu0 %v6467_v30 }
 0x313   :  { %6086 = vmatprep.subr.bf16.mxu1 %v6468_v3  ;;  %6114 = vmatprep.subr.bf16.mxu0 %v6469_v60 }
 0x316   :  { %6087 = vmatpush3.bf16.msra.mxu1 %v6470_v15  ;;  %6115 = vmatpush3.bf16.msra.mxu0 %v6471_v32 }
 0x317   :  { %6088 = vmatprep.subr.bf16.mxu1 %v6472_v9  ;;  %6116 = vmatprep.subr.bf16.mxu0 %v6473_v35 }
 0x31a   :  { %6089 = vmatpush3.bf16.msra.mxu1 %v6474_v50  ;;  %6117 = vmatpush3.bf16.msra.mxu0 %v6475_v1 }
 0x31b   :  { %6130 = vmatprep.subr.bf16.mxu1 %v6476_v19  ;;  %6158 = vmatprep.subr.bf16.mxu0 %v8096_v27 }
 0x31d   :  { %5208 = vmatmul.mubr.bf16.vlgmr.msra.gmra.mrb[48].mxu1 %v4077_v6  ;;  %5256 = vmatmul.mubr.bf16.vlgmr.msra.gmra.mrb[64].mxu0 %v4078_v52  ;;  %v4157_v6 = vrot.slane %v4141_v63, %v6726_v57  ;;  %v4180_v57 = vcombine.high %v4164_v51, %v4164_v51 }
 0x31e   :  { %5215 = vmatprep.mubr.bf16.mxu1 %v4171_v14  ;;  %5263 = vmatprep.mubr.bf16.mxu0 %v4181_v0 }
 0x31f   :  { %6131 = vmatpush3.bf16.msra.mxu1 %v6478_v29  ;;  %6159 = vmatpush3.bf16.msra.mxu0 %v8106_v25  ;;  %v4179_v52 = vcombine.high %v4157_v6, %v4157_v6 }
 0x320   :  { %6132 = vmatprep.subr.bf16.mxu1 %v6480_v40  ;;  %6160 = vmatprep.subr.bf16.mxu0 %v8114_v43 }
 0x323   :  { %6133 = vmatpush3.bf16.msra.mxu1 %v6482_v41  ;;  %6161 = vmatpush3.bf16.msra.mxu0 %v8129_v45 }
 0x324   :  { %6134 = vmatprep.subr.bf16.mxu1 %v6484_v10  ;;  %6162 = vmatprep.subr.bf16.mxu0 %v8139_v61 }
 0x325   :  { %5216 = vmatmul.mubr.bf16.gmra.mrb[52].mxu1 %v4157_v6  ;;  %5264 = vmatmul.mubr.bf16.gmra.mrb[68].mxu0 %v4179_v52 }
 0x326   :  { %5303 = vmatprep.mubr.bf16.mxu1 %v4083_v53  ;;  %5351 = vmatprep.mubr.bf16.mxu0 %v4084_v39  ;;  %v6492_v53 = vld [vmem:[%s8248_s7 + $0x360] sm:$0xff]  }
 0x327   :  { %6135 = vmatpush3.bf16.msra.mxu1 %v6486_v11  ;;  %6163 = vmatpush3.bf16.msra.mxu0 %v6487_v8  ;;  %v6495_v39 = vld [vmem:[%s8248_s7 + $0x3a0] sm:$0xff]  }
 0x328   :  { %6136 = vmatprep.subr.bf16.mxu1 %v6488_v28  ;;  %6164 = vmatprep.subr.bf16.mxu0 %v6489_v33 }
 0x32b   :  { %6137 = vmatpush3.bf16.msra.mxu1 %v6490_v22  ;;  %6165 = vmatpush3.bf16.msra.mxu0 %v6491_v34 }
 0x32c   :  { %6138 = vmatprep.subr.bf16.mxu1 %v6492_v53  ;;  %6166 = vmatprep.subr.bf16.mxu0 %v6493_v47 }
 0x32f   :  { %6139 = vmatpush3.bf16.msra.mxu1 %v6494_v7  ;;  %6167 = vmatpush3.bf16.msra.mxu0 %v6495_v39 }
 0x330   :  { %6140 = vmatprep.subr.bf16.mxu1 %v6496_v46  ;;  %6168 = vmatprep.subr.bf16.mxu0 %v6497_v38 }
 0x333   :  { %6141 = vmatpush3.bf16.msra.mxu1 %v6498_v12  ;;  %6169 = vmatpush3.bf16.msra.mxu0 %v6499_v42 }
 0x334   :  { %6142 = vmatprep.subr.bf16.mxu1 %v6500_v26  ;;  %6170 = vmatprep.subr.bf16.mxu0 %v6501_v5 }
 0x337   :  { %6143 = vmatpush3.bf16.msra.mxu1 %v6502_v49  ;;  %6171 = vmatpush3.bf16.msra.mxu0 %v6503_v36 }
 0x338   :  { %6144 = vmatprep.subr.bf16.mxu1 %v6504_v56  ;;  %6172 = vmatprep.subr.bf16.mxu0 %v6505_v54 }
 0x33b   :  { %6145 = vmatpush3.bf16.msra.mxu1 %v6506_v55  ;;  %6173 = vmatpush3.bf16.msra.mxu0 %v6507_v21 }
 0x33c   :  { %6218 = vmatprep.subr.bf16.mxu1 %v8096_v27 }
 0x33e   :  { %5304 = vmatmul.mubr.bf16.vlgmr.msra.gmra.mrb[56].mxu1 %v4079_v13  ;;  %5352 = vmatmul.mubr.bf16.vlgmr.msra.gmra.mrb[72].mxu0 %v4080_v16 }
 0x33f   :  { %6226 = vmatpush3.bf16.msra.mxu1 %v8106_v25  ;;  %5311 = vmatprep.mubr.bf16.mxu1 %v6754_v23  ;;  %v5574_v23 = vld [vmem:[%s8251_s8] ss:$0 sm:$0xff] }
 0x340   :  { %6219 = vmatprep.subr.bf16.mxu1 %v8114_v43 }
 0x343   :  { %6227 = vmatpush3.bf16.msra.mxu1 %v8129_v45 }
 0x344   :  { %6220 = vmatprep.subr.bf16.mxu1 %v8139_v61 }
 0x346   :  { %5312 = vmatmul.mubr.bf16.gmra.mrb[60].mxu1 %v4164_v51 }
 0x347   :  { %6228 = vmatpush3.bf16.msra.mxu1 %v6487_v8  ;;  %5359 = vmatprep.mubr.bf16.mxu1 %v4182_v31 }
 0x348   :  { %6221 = vmatprep.subr.bf16.mxu1 %v6489_v33 }
 0x34b   :  { %6229 = vmatpush3.bf16.msra.mxu1 %v6491_v34 }
 0x34c   :  { %6222 = vmatprep.subr.bf16.mxu1 %v6493_v47 }
 0x34f   :  { %6230 = vmatpush3.bf16.msra.mxu1 %v6495_v39 }
 0x350   :  { %6223 = vmatprep.subr.bf16.mxu1 %v6497_v38 }
 0x353   :  { %6231 = vmatpush3.bf16.msra.mxu1 %v6499_v42 }
 0x354   :  { %6224 = vmatprep.subr.bf16.mxu1 %v6501_v5 }
 0x357   :  { %6232 = vmatpush3.bf16.msra.mxu1 %v6503_v36 }
 0x358   :  { %6225 = vmatprep.subr.bf16.mxu1 %v6505_v54 }
 0x35b   :  { %6233 = vmatpush3.bf16.msra.mxu1 %v6507_v21 }
 0x35e   :  { %5360 = vmatmul.mubr.bf16.vlgmr.msra.gmra.mrb[64].mxu1 %v4180_v57 }
 0x3af   :  { %v5978_v2 = vpop.f32.mrb[32].mxu1  ;;  %v6006_v48 = vpop.f32.mrb[48].mxu0 }
 0x3b0   :  { %v5979_v59 = vpop.f32.mrb[33].mxu1  ;;  %v6007_v13 = vpop.f32.mrb[49].mxu0 }
 0x3b1   :  { %v5980_v16 = vadd.f32 %v5979_v59, %v5978_v2  ;;  %v6008_v44 = vadd.f32 %v6007_v13, %v6006_v48  ;;  %v5981_v18 = vpop.f32.mrb[34].mxu1  ;;  %v6009_v24 = vpop.f32.mrb[50].mxu0 }
 0x3b2   :  { %v5982_v17 = vpop.f32.mrb[35].mxu1  ;;  %v6010_v37 = vpop.f32.mrb[51].mxu0 }
 0x3b3   :  { %v5018_v20 = vadd.f32 %v5980_v16, %v5574_v23  ;;  %v5983_v62 = vadd.f32 %v5982_v17, %v5981_v18  ;;  %v6011_v4 = vadd.f32 %v6010_v37, %v6009_v24 }
 0x3b5   :  { %v5066_v30 = vadd.f32 %v6008_v44, %v5018_v20  ;;  %v5021_v3 = vadd.f32 %v5983_v62, %v5574_v23 }
 0x3b7   :  { %v5069_v60 = vadd.f32 %v6011_v4, %v5021_v3  ;;  %v5984_v63 = vpop.f32.mrb[36].mxu1  ;;  %v6012_v15 = vpop.f32.mrb[52].mxu0 }
 0x3b8   :  { %v5985_v32 = vpop.f32.mrb[37].mxu1  ;;  %v6013_v9 = vpop.f32.mrb[53].mxu0 }
 0x3b9   :  { %v5986_v35 = vadd.f32 %v5985_v32, %v5984_v63  ;;  %v6014_v58 = vadd.f32 %v6013_v9, %v6012_v15  ;;  %v5987_v50 = vpop.f32.mrb[38].mxu1  ;;  %v6015_v1 = vpop.f32.mrb[54].mxu0 }
 0x3ba   :  { %v5988_v19 = vpop.f32.mrb[39].mxu1  ;;  %v6016_v27 = vpop.f32.mrb[55].mxu0 }
 0x3bb   :  { %v5026_v14 = vadd.f32 %v5986_v35, %v5574_v23 }
 0x3bd   :  { %v5074_v29 = vadd.f32 %v6014_v58, %v5026_v14 }
 0x3cf   :  { %v6034_v25 = vpop.f32.mrb[40].mxu1  ;;  %v6062_v0 = vpop.f32.mrb[56].mxu0 }
 0x3d0   :  { %v6035_v40 = vpop.f32.mrb[41].mxu1  ;;  %v6063_v43 = vpop.f32.mrb[57].mxu0 }
 0x3d1   :  { %v6036_v41 = vadd.f32 %v6035_v40, %v6034_v25  ;;  %v6064_v45 = vadd.f32 %v6063_v43, %v6062_v0  ;;  %v6037_v6 = vpop.f32.mrb[42].mxu1  ;;  %v6065_v10 = vpop.f32.mrb[58].mxu0 }
 0x3d2   :  { %v6038_v61 = vpop.f32.mrb[43].mxu1  ;;  %v6066_v52 = vpop.f32.mrb[59].mxu0 }
 0x3d3   :  { %v5114_v11 = vadd.f32 %v6036_v41, %v5066_v30  ;;  %v6039_v8 = vadd.f32 %v6038_v61, %v6037_v6  ;;  %v6067_v28 = vadd.f32 %v6066_v52, %v6065_v10 }
 0x3d5   :  { %v5162_v33 = vadd.f32 %v6064_v45, %v5114_v11  ;;  %v5117_v22 = vadd.f32 %v6039_v8, %v5069_v60 }
 0x3d7   :  { %v5165_v34 = vadd.f32 %v6067_v28, %v5117_v22  ;;  %v6040_v53 = vpop.f32.mrb[44].mxu1  ;;  %v6068_v47 = vpop.f32.mrb[60].mxu0 }
 0x3d8   :  { %v6041_v7 = vpop.f32.mrb[45].mxu1  ;;  %v6069_v39 = vpop.f32.mrb[61].mxu0 }
 0x3d9   :  { %v6042_v46 = vadd.f32 %v6041_v7, %v6040_v53  ;;  %v6070_v38 = vadd.f32 %v6069_v39, %v6068_v47  ;;  %v6043_v12 = vpop.f32.mrb[46].mxu1  ;;  %v6071_v42 = vpop.f32.mrb[62].mxu0 }
 0x3da   :  { %v6044_v26 = vpop.f32.mrb[47].mxu1  ;;  %v6072_v5 = vpop.f32.mrb[63].mxu0 }
 0x3db   :  { %v5122_v49 = vadd.f32 %v6042_v46, %v5074_v29 }
 0x3dd   :  { %v5170_v36 = vadd.f32 %v6070_v38, %v5122_v49 }
 0x3f0   :  { %v6090_v56 = vpop.f32.mrb[48].mxu1  ;;  %v6118_v54 = vpop.f32.mrb[64].mxu0 }
 0x3f1   :  { %v6091_v55 = vpop.f32.mrb[49].mxu1  ;;  %v6119_v21 = vpop.f32.mrb[65].mxu0 }
 0x3f2   :  { %v6092_v51 = vadd.f32 %v6091_v55, %v6090_v56  ;;  %v6120_v31 = vadd.f32 %v6119_v21, %v6118_v54  ;;  %v6093_v57 = vpop.f32.mrb[50].mxu1  ;;  %v6121_v2 = vpop.f32.mrb[66].mxu0 }
 0x3f3   :  { %v6094_v48 = vpop.f32.mrb[51].mxu1  ;;  %v6122_v23 = vpop.f32.mrb[67].mxu0 }
 0x3f4   :  { %v5210_v59 = vadd.f32 %v6092_v51, %v5162_v33  ;;  %v6095_v13 = vadd.f32 %v6094_v48, %v6093_v57  ;;  %v6123_v16 = vadd.f32 %v6122_v23, %v6121_v2 }
 0x3f6   :  { %v5258_v44 = vadd.f32 %v6120_v31, %v5210_v59  ;;  %v5213_v18 = vadd.f32 %v6095_v13, %v5165_v34 }
 0x3f8   :  { %v5261_v24 = vadd.f32 %v6123_v16, %v5213_v18  ;;  %v6096_v17 = vpop.f32.mrb[52].mxu1  ;;  %v6124_v37 = vpop.f32.mrb[68].mxu0 }
 0x3f9   :  { %v6097_v20 = vpop.f32.mrb[53].mxu1  ;;  %v6125_v62 = vpop.f32.mrb[69].mxu0 }
 0x3fa   :  { %v6098_v4 = vadd.f32 %v6097_v20, %v6096_v17  ;;  %v6126_v30 = vadd.f32 %v6125_v62, %v6124_v37  ;;  %v6099_v3 = vpop.f32.mrb[54].mxu1  ;;  %v6127_v60 = vpop.f32.mrb[70].mxu0 }
 0x3fb   :  { %v6100_v63 = vpop.f32.mrb[55].mxu1  ;;  %v6128_v15 = vpop.f32.mrb[71].mxu0 }
 0x3fc   :  { %v5218_v32 = vadd.f32 %v6098_v4, %v5170_v36 }
 0x3fe   :  { %v5266_v9 = vadd.f32 %v6126_v30, %v5218_v32 }
 0x411   :  { %v6146_v35 = vpop.f32.mrb[56].mxu1  ;;  %v6174_v58 = vpop.f32.mrb[72].mxu0 }
 0x412   :  { %v6147_v50 = vpop.f32.mrb[57].mxu1  ;;  %v6175_v1 = vpop.f32.mrb[73].mxu0 }
 0x413   :  { %v6148_v19 = vadd.f32 %v6147_v50, %v6146_v35  ;;  %v6176_v27 = vadd.f32 %v6175_v1, %v6174_v58  ;;  %v6149_v14 = vpop.f32.mrb[58].mxu1  ;;  %v6177_v29 = vpop.f32.mrb[74].mxu0 }
 0x414   :  { %v6150_v25 = vpop.f32.mrb[59].mxu1  ;;  %v6178_v0 = vpop.f32.mrb[75].mxu0 }
 0x415   :  { %v5306_v40 = vadd.f32 %v6148_v19, %v5258_v44  ;;  %v6151_v43 = vadd.f32 %v6150_v25, %v6149_v14  ;;  %v6179_v41 = vadd.f32 %v6178_v0, %v6177_v29 }
 0x417   :  { %v5354_v45 = vadd.f32 %v6176_v27, %v5306_v40  ;;  %v5309_v6 = vadd.f32 %v6151_v43, %v5261_v24 }
 0x419   :  { %v5719_v10 = vmul.f32 -1.442695, %v5354_v45  ;;  %v5357_v61 = vadd.f32 %v6179_v41, %v5309_v6  ;;  %v6152_v52 = vpop.f32.mrb[60].mxu1 }
 0x41a   :  { %v6153_v11 = vpop.f32.mrb[61].mxu1 }
 0x41b   :  { %6510 = vpow2.f32 %v5719_v10  ;;  %v5720_v8 = vmul.f32 -1.442695, %v5357_v61  ;;  %v6154_v28 = vadd.f32 %v6153_v11, %v6152_v52  ;;  %v6155_v33 = vpop.f32.mrb[62].mxu1 }
 0x41c   :  { %v6156_v22 = vpop.f32.mrb[63].mxu1 }
 0x41d   :  { %6512 = vpow2.f32 %v5720_v8  ;;  %v5314_v34 = vadd.f32 %v6154_v28, %v5266_v9 }
 0x425   :  { %v6511_v53 = vpop.eup %6510 }
 0x426   :  { %v5376_v47 = vadd.f32 1.0, %v6511_v53 }
 0x427   :  { %v6513_v7 = vpop.eup %6512 }
 0x428   :  { %6514 = vrcp.f32 %v5376_v47  ;;  %v5377_v39 = vadd.f32 1.0, %v6513_v7 }
 0x42a   :  { %6516 = vrcp.f32 %v5377_v39 }
 0x431   :  { %v6180_v46 = vpop.f32.mrb[64].mxu1 }
 0x432   :  { %v6515_v38 = vpop.eup %6514  ;;  %v6181_v12 = vpop.f32.mrb[65].mxu1 }
 0x433   :  { %5385 = vst [vmem:[%s8252_s9] sm:$0xff] %v6515_v38  ;;  %v6182_v42 = vadd.f32 %v6181_v12, %v6180_v46  ;;  %v6183_v26 = vpop.f32.mrb[66].mxu1 }
 0x434   :  { %v6517_v5 = vpop.eup %6516  ;;  %v6184_v49 = vpop.f32.mrb[67].mxu1 }
 0x435   :  { %5386 = vst [vmem:[%s8252_s9 + $0x8] sm:$0xff] %v6517_v5  ;;  %v5362_v36 = vadd.f32 %v6182_v42, %v5314_v34 }
 0x437   :  { %v5721_v56 = vmul.f32 -1.442695, %v5362_v36 }
 0x439   :  { %6518 = vpow2.f32 %v5721_v56 }
 0x443   :  { %v6519_v54 = vpop.eup %6518 }
 0x444   :  { %v5378_v55 = vadd.f32 1.0, %v6519_v54 }
 0x446   :  { %6520 = vrcp.f32 %v5378_v55 }
 0x450   :  { %v6521_v21 = vpop.eup %6520 }
 0x451   :  { %5387 = vst [vmem:[%s8252_s9 + $0x10] sm:$0x3] %v6521_v21 }

</bundles_post_ra>
